<compile_context>
chip_gen: v7x
topology: tpu7x:2x2x1
jax: 0.10.0
libtpu: 0.0.40
codegen_flags: <defaults>
</compile_context>

<pallas_src>
import jax
import jax.numpy as jnp
import numpy as np
from jax.experimental import pallas as pl
from jax.experimental.pallas import tpu as pltpu


def _posenet_kernel(cam_ref, table_ref, out_ref):
    """cam_ref:   (1, TILE_B)  int32   per-frame camera index (padded tail = 0)
       table_ref: (16, C_PAD)  float32 per-camera row-major flattened (c2w @ base)
       out_ref:   (16, TILE_B) float32 selected pose, one column per frame."""
    c_pad = table_ref.shape[1]
    cam = cam_ref[...]                                              # (1, TILE_B)
    # Slim one-hot: (C_pad, 1) iota broadcast-compared against (1, TILE_B) ids,
    # emitted directly in f32 (no full int32 iota, no separate convert).
    col_iota = jax.lax.broadcasted_iota(jnp.int32, (c_pad, 1), 0)   # (C_PAD, 1)
    onehot = jnp.where(col_iota == cam, 1.0, 0.0)                   # (C_PAD, TILE_B) f32
    # Exact gather via the otherwise-idle MXU; single unmasked lane-dense store.
    out_ref[...] = jnp.dot(table_ref[...], onehot,
                           preferred_element_type=jnp.float32,
                           precision=jax.lax.Precision.HIGHEST)


def _round_up(x, m):
    return ((x + m - 1) // m) * m


def _axis_angle_t_to_matrix(r, t):
    """Rodrigues + homogeneous [R|t; 0 0 0 1].  r, t: (N, 3) -> (N, 4, 4)."""
    rx, ry, rz = r[:, 0], r[:, 1], r[:, 2]
    theta2 = rx * rx + ry * ry + rz * rz
    theta = jnp.sqrt(theta2)
    small = theta2 < 1e-12
    safe_t = jnp.where(small, 1.0, theta)
    a = jnp.where(small, 1.0 - theta2 / 6.0, jnp.sin(theta) / safe_t)
    b = jnp.where(small, 0.5 - theta2 / 24.0,
                  (1.0 - jnp.cos(theta)) / jnp.where(small, 1.0, theta2))
    zeros = jnp.zeros_like(rx)
    K = jnp.stack([jnp.stack([zeros, -rz, ry], -1),
                   jnp.stack([rz, zeros, -rx], -1),
                   jnp.stack([-ry, rx, zeros], -1)], -2)            # (N, 3, 3)
    I = jnp.eye(3, dtype=r.dtype)[None]
    R = I + a[:, None, None] * K + b[:, None, None] * (K @ K)
    N = r.shape[0]
    M = jnp.zeros((N, 4, 4), dtype=r.dtype)
    M = M.at[:, :3, :3].set(R)
    M = M.at[:, :3, 3].set(t)
    M = M.at[:, 3, 3].set(1.0)
    return M


def _camera_table(r_param, t_param, base_c2w):
    """Per-camera math hoisted out of the kernel: (16, C_pad) lane-dense table,
    column c = row-major flattened (axis_angle_t_to_matrix(r_c, t_c) @ base_c)."""
    num_cams = r_param.shape[0]
    r = r_param.astype(jnp.float32)
    t = t_param.astype(jnp.float32)
    M = _axis_angle_t_to_matrix(r, t)                               # (C, 4, 4)
    composed = jnp.einsum('cij,cjk->cik', M, base_c2w.astype(jnp.float32),
                          precision=jax.lax.Precision.HIGHEST)      # (C, 4, 4)
    c_pad = _round_up(max(num_cams, 1), 128)
    table = jnp.zeros((16, c_pad), jnp.float32)
    table = table.at[:, :num_cams].set(composed.reshape(num_cams, 16).T)
    return table


def posenet_forward(r_param, t_param, base_c2w, cam_id, *, tile_b=4096,
                    return_lane_dense=False):
    """r_param, t_param: (num_cams, 3); base_c2w: (num_cams, 4, 4); cam_id: (B,) int.
    Returns (B, 4, 4) float32 (or (16, B) lane-dense if return_lane_dense=True)."""
    num_cams = r_param.shape[0]
    B = int(cam_id.shape[0])

    # Hoisted per-camera Rodrigues + compose (tiny, plain JAX).
    table = _camera_table(r_param, t_param, base_c2w)               # (16, C_pad)
    c_pad = table.shape[1]

    # Batch on lanes.  Large tiles amortize per-step pipeline overhead, but keep
    # >= 2 grid steps when possible so the "parallel" axis splits across both
    # v7x TensorCores (v5e/v6e have one TC and just take the largest tile).
    b128 = _round_up(max(B, 1), 128)
    cap = max(128, _round_up(b128 // 2, 128)) if b128 >= 256 else b128
    tile_b = min(_round_up(int(tile_b), 128), cap)
    b_pad = _round_up(B, tile_b)

    cam = jnp.clip(cam_id.astype(jnp.int32), 0, num_cams - 1)       # guard OOR ids
    cam = jnp.zeros((1, b_pad), jnp.int32).at[0, :B].set(cam)       # padded tail -> cam 0

    cost = pl.CostEstimate(
        flops=2 * 16 * c_pad * b_pad,
        transcendentals=0,
        bytes_accessed=4 * (16 * b_pad + b_pad + 16 * c_pad))

    out = pl.pallas_call(
        _posenet_kernel,
        out_shape=jax.ShapeDtypeStruct((16, b_pad), jnp.float32),
        grid_spec=pltpu.PrefetchScalarGridSpec(
            num_scalar_prefetch=0,
            grid=(b_pad // tile_b,),
            in_specs=[
                pl.BlockSpec((1, tile_b), lambda i: (0, i)),        # cam ids, lane-tiled
                pl.BlockSpec((16, c_pad), lambda i: (0, 0)),        # whole camera table
            ],
            out_specs=pl.BlockSpec((16, tile_b), lambda i: (0, i)),
        ),
        compiler_params=pltpu.CompilerParams(
            dimension_semantics=("parallel",)),
        cost_estimate=cost,
    )(cam, table)

    if return_lane_dense:
        return out[:, :B]            # (16, B): let the consumer fuse the transpose
    # Layout plumbing back to the module's (B, 4, 4) row-major convention.
    return out[:, :B].T.reshape(B, 4, 4)


# ---------------- plain-JAX reference (for correctness check) ----------------
def posenet_forward_ref(r_param, t_param, base_c2w, cam_id):
    r = jnp.take(r_param.astype(jnp.float32), cam_id, axis=0)
    t = jnp.take(t_param.astype(jnp.float32), cam_id, axis=0)
    base = jnp.take(base_c2w.astype(jnp.float32), cam_id, axis=0)
    M = _axis_angle_t_to_matrix(r, t)
    return jnp.einsum('bij,bjk->bik', M, base, precision=jax.lax.Precision.HIGHEST)


if __name__ == "__main__":
    num_cams = 8
    B = 1000   # frames; exercises lane padding and a 2-step batch grid

    key = jax.random.PRNGKey(0)
    k1, k2, k3, k4, k5 = jax.random.split(key, 5)

    # Module __init__ uses zeros for r, t; perturb them deterministically so the
    # Rodrigues path is exercised.  Keep one exactly-zero row to hit the
    # small-angle branch (matches the zero init).
    r_param = 0.3 * jax.random.normal(k1, (num_cams, 3), dtype=jnp.float32)
    t_param = 0.5 * jax.random.normal(k2, (num_cams, 3), dtype=jnp.float32)
    r_param = r_param.at[0].set(0.0)
    t_param = t_param.at[0].set(0.0)

    # Deterministic ground-truth base c2w poses stored in model_input['c2w'].
    base_r = 0.4 * jax.random.normal(k3, (num_cams, 3), dtype=jnp.float32)
    base_t = jax.random.normal(k4, (num_cams, 3), dtype=jnp.float32)
    base_c2w = _axis_angle_t_to_matrix(base_r, base_t)              # (num_cams, 4, 4)

    cam_id = jax.random.randint(k5, (B,), 0, num_cams, dtype=jnp.int32)

    # TODO(synk): GTPose(inverse=True) branch (rigid 4x4 inverse of the stored
    # pose) is not implemented; key='c2w', inverse=False is assumed.

    out = posenet_forward(r_param, t_param, base_c2w, cam_id)
    out = jax.block_until_ready(out)

    ref = posenet_forward_ref(r_param, t_param, base_c2w, cam_id)
    np.testing.assert_allclose(np.asarray(out), np.asarray(ref), rtol=1e-5, atol=1e-5)

    print("KERNEL_OK")
</pallas_src>

<mosaic_0001>
module attributes {stable_mosaic.version = 11 : i64} {
  func.func @_posenet_kernel(%arg0: i32, %arg1: memref<1x512xi32, #tpu.memory_space<vmem>>, %arg2: memref<16x128xf32, #tpu.memory_space<vmem>>, %arg3: memref<16x512xf32, #tpu.memory_space<vmem>>) attributes {dimension_semantics = [#tpu.dimension_semantics<parallel>], iteration_bounds = array<i64: 2>, scalar_prefetch = 0 : i64, scratch_operands = 0 : i64, tpu.core_type = #tpu.core_type<tc>, window_params = [{transform_indices = @transform_0, window_bounds = array<i64: 1, 512>}, {pipeline_mode = #tpu.pipeline_mode<synchronous>, transform_indices = @transform_1, window_bounds = array<i64: 16, 128>}, {transform_indices = @transform_2, window_bounds = array<i64: 16, 512>}]} {
    %c0 = arith.constant 0 : index
    %c0_0 = arith.constant 0 : index
    %0 = vector.load %arg1[%c0, %c0_0] : memref<1x512xi32, #tpu.memory_space<vmem>>, vector<1x512xi32>
    %1 = tpu.iota {dimensions = array<i32: 0>} : vector<128x1xi32>
    %2 = vector.broadcast %1 : vector<128x1xi32> to vector<128x512xi32>
    %3 = vector.broadcast %0 : vector<1x512xi32> to vector<128x512xi32>
    %4 = arith.cmpi eq, %2, %3 : vector<128x512xi32>
    %cst = arith.constant 1.000000e+00 : f32
    %cst_1 = arith.constant 0.000000e+00 : f32
    %5 = vector.broadcast %cst : f32 to vector<128x512xf32>
    %6 = vector.broadcast %cst_1 : f32 to vector<128x512xf32>
    %7 = arith.select %4, %5, %6 : vector<128x512xi1>, vector<128x512xf32>
    %c0_2 = arith.constant 0 : index
    %c0_3 = arith.constant 0 : index
    %8 = vector.load %arg2[%c0_2, %c0_3] : memref<16x128xf32, #tpu.memory_space<vmem>>, vector<16x128xf32>
    %cst_4 = arith.constant dense<0.000000e+00> : vector<16x512xf32>
    %9 = tpu.matmul %8, %7, %cst_4 {dimension_numbers = #tpu.dot_dimension_numbers<[1], [0], [0], [1], [0, 0, 1, 1], [], []>, precision = #tpu.contract_precision<fp32>} : vector<16x128xf32>, vector<128x512xf32>, vector<16x512xf32> -> vector<16x512xf32>
    %c0_5 = arith.constant 0 : index
    %c0_6 = arith.constant 0 : index
    %10 = vector.load %arg3[%c0_5, %c0_6] : memref<16x512xf32, #tpu.memory_space<vmem>>, vector<16x512xf32>
    tpu.vector_store %arg3[%c0_5, %c0_6], %9 {strides = array<i32>} : memref<16x512xf32, #tpu.memory_space<vmem>>, vector<16x512xf32>,
    return
  }
  func.func @transform_0(%arg0: i32) -> (i32, i32) {
    %c0_i32 = arith.constant 0 : i32
    %c0_i32_0 = arith.constant 0 : i32
    return %c0_i32, %arg0 : i32, i32
  }
  func.func @transform_1(%arg0: i32) -> (i32, i32) {
    %c0_i32 = arith.constant 0 : i32
    %c0_i32_0 = arith.constant 0 : i32
    %c0_i32_1 = arith.constant 0 : i32
    return %c0_i32, %c0_i32_0 : i32, i32
  }
  func.func @transform_2(%arg0: i32) -> (i32, i32) {
    %c0_i32 = arith.constant 0 : i32
    %c0_i32_0 = arith.constant 0 : i32
    return %c0_i32, %arg0 : i32, i32
  }
}

</mosaic_0001>

<bundles_post_ra>
// kernel: tpu_custom_call.1
= control target key start
LH: loop header
LB: loop body
LE: loop exit
PB: predicated region body
PF: predicated region fallthrough
CT: control target
= control target key end

     0   :  { %7 = vsyncpa [#allocation3], 0  ;;  %s4312_s0 = inlined_call_operand.hbm [shape: s32[1,1024], index: 0, kind: input, shape index: {}]   ;;  %s4313_s1 = inlined_call_operand.hbm [shape: f32[16,128], index: 1, kind: input, shape index: {}]   ;;  %s4314_s2 = inlined_call_operand.hbm [shape: f32[16,1024], index: 2, kind: output, shape index: {}]  }
   0x1   :  { %9 = vsyncpa [#allocation3 + $0x1], 0 }
   0x2   :  { %10 = vsyncpa [#allocation6], 0 }
   0x3   :  { %11 = vsyncpa [#allocation4], 0 }
   0x4   :  { %13 = vsyncpa [#allocation4 + $0x1], 0  ;;  %s2723_s9 = smov 0   ;;  %s2725_s10 = smov 0  }
   0x5   :  { %s2727_s11 = smov 0   ;;  %s2729_s12 = smov 0  }
   0x6 LB: > { %s2744_s13 = sadd.s32 4294967295, %s2696_s12   ;;  %s1870_s14 = sadd.s32 4294967294, %s2696_s12   ;;  %s2696_s12 = sphi %s2729_s12, %s4926_s12   ;;  %s2692_s11 = sphi %s2727_s11, %s4925_s11   ;;  %s2688_s10 = sphi %s2725_s10, %s4924_s10   ;;  %s2684_s9 = sphi %s2723_s9, %s4923_s9  }
   0x7   : > { %p39_p0 = scmp.ne.s32.totalorder %s2688_s10, %s2684_s9  ;;  %p4315_p1 = scmp.eq.s32.totalorder %s2744_s13, 0 }
   0x8   : > { %p90_p3 = scmp.eq.s32.totalorder %s1870_s14, 1  ;;  %p1871_p5 = scmp.ge.s32.totalorder %s2696_s12, 1 }
   0x9   : > { %p2753_p4 = por %p4315_p1, %p39_p0  ;;  %p97_p7 = scmp.lt.s32.totalorder %s2696_s12, 3 }
   0xa   : > { %p2758_p6 = por %p90_p3, %p39_p0  ;;  %s2698_s18 = smov [#allocation5]  }
   0xb   : > { %s4539_s15 = scalar_select %p2753_p4, 1, 0 }
   0xc   : > { %s4540_s16 = scalar_select %p2758_p6, 1, 0 }
   0xd   : > { %p2763_p8 = pnand %p1871_p5, %p97_p7  ;;  %s109_s19 = sshll.u32 %s2698_s18, 4  ;;  %s2767_s19 = int_to_ptr.vmem [resolvable:$true] %s109_s19 }
   0xe   : > { %s2779_s21 = sadd.s32 1, %s2696_s12   ;;  %s26_s22 = sadd.s32 1, %s2692_s11 }
   0xf   : > { %s4541_s17 = scalar_select %p2763_p8, 1, 0 }
  0x10   : > { %p2512_p9 = pneg %p2763_p8  ;;  %s23_s23 = ssub.s32 %s2696_s12, %s2779_s21 }
  0x11   : > { %s2568_s26 = scalar_lea.hbm %s4313_s1, 256 }
  0x12   : > { %p2774_p11 = pnand %p2512_p9, %p4315_p1  ;;  %p2569_p12 = scmp.ne.s32.totalorder %s4313_s1, %s2568_s26 }
  0x13   : > { %p2575_p5 = scmp.lt.u32.totalorder %s2568_s26, %s4313_s1 }
  0x14   : > { %p2570_p13 = pneg %p2774_p11 }
  0x16   : > { %p2571_p0 = pnand %p2570_p13, %p2569_p12 }
  0x18   : > { %p2572_p3 = pneg %p2571_p0 }
  0x1a   : > { %p2577_p7 = pnand %p2575_p5, %p2572_p3 }
  0x1c   : > { %2580 = shalt.err (!%p2577_p7)
}
  0x1d   : > { %s2581_s3 = scalar_lea.vmem %s2767_s19, 256  ;;  %p2589_p2 = scmp.lt.s32.totalorder %s2767_s19, %s2767_s19 }
  0x1e   : > { %p2582_p9 = scmp.ne.s32.totalorder %s2767_s19, %s2581_s3  ;;  %p2590_p6 = scmp.lt.s32.totalorder %s2581_s3, %s2581_s3 }
  0x20   : > { %p2584_p10 = pnand %p2582_p9, %p2570_p13  ;;  %p2591_p4 = por %p2590_p6, %p2589_p2 }
  0x22   : > { %p2585_p1 = pneg %p2584_p10 }
  0x24   : > { %p2592_p8 = pnand %p2591_p4, %p2585_p1 }
  0x26   : > { %2595 = shalt.err (!%p2592_p8)
}
  0x27   : > { %s2699_s4 = smov 128   ;;  %s2700_s5 = smov 8  }
  0x28   : > { %2515 = dma.hbm_to_vmem [thread:$0]  (!%p2774_p11), %s4313_s1, 256, %s2767_s19, [#allocation6], %s2699_s4, %s2699_s4, %s2700_s5  }
  0x29   : > { %p24_p2 = scmp.eq.s32.totalorder %s23_s23, 0  ;;  %p33_p1 = scmp.ne.s32.totalorder %s2692_s11, %s2688_s10 }
  0x2a   : > { %p34_p4 = scmp.eq.s32.totalorder %s2696_s12, 0  ;;  %p2525_p6 = scmp.lt.s32.totalorder %s2696_s12, 2 }
  0x2b   : > { %s2810_s8 = scalar_select %p24_p2, %s2692_s11, %s26_s22  }
  0x2c   : > { %p35_p8 = por %p34_p4, %p33_p1  ;;  %p4543_p10 = scmp.eq.s32.totalorder %s2744_s13, 1 }
  0x2d   : > { %s123_s18 = sand.u32 1, %s2692_s11   ;;  %s2078_s24 = sshll.u32 %s2696_s12, 6 }
  0x2e   : > { %p2814_p12 = por %p4543_p10, %p33_p1  ;;  %s1874_s25 = sshll.u32 %s123_s18, 2 }
  0x2f   : > { %s2823_s27 = scalar_lea.hbm %s4312_s0, %s2078_s24  ;;  %s127_s19 = scalar_lea.vmem [#allocation2], %s1874_s25 }
  0x30   : > { %s135_s22 = sshll.u32 %s127_s19, 4  ;;  %p2825_p11 = pnand %p2525_p6, %p35_p8  ;;  %s2829_s22 = int_to_ptr.vmem [resolvable:$true] %s135_s22 }
  0x31   : > { %s124_s28 = scalar_lea.sflag [#allocation3], %s123_s18  ;;  %s2596_s29 = scalar_lea.hbm %s2823_s27, 64 }
  0x32   : > { %p2597_p13 = scmp.ne.s32.totalorder %s2823_s27, %s2596_s29  ;;  %p2598_p0 = pneg %p2825_p11 }
  0x33   : > { %s2601_s4 = scalar_lea.hbm %s4312_s0, 128  ;;  %p2602_p7 = scmp.lt.u32.totalorder %s2823_s27, %s4312_s0 }
  0x34   : > { %p2599_p3 = pnand %p2598_p0, %p2597_p13  ;;  %p2603_p9 = scmp.lt.u32.totalorder %s2601_s4, %s2596_s29 }
  0x35   : > { %p2605_p1 = scmp.lt.u32.totalorder %s2596_s29, %s2823_s27 }
  0x36   : > { %p2600_p5 = pneg %p2599_p3  ;;  %p2604_p2 = por %p2603_p9, %p2602_p7 }
  0x38   : > { %p2606_p4 = por %p2605_p1, %p2604_p2 }
  0x3a   : > { %p2607_p6 = pnand %p2606_p4, %p2600_p5 }
  0x3c   : > { %2610 = shalt.err (!%p2607_p6)
}
  0x3d   : > { %s2611_s7 = scalar_lea.vmem %s2829_s22, 64  ;;  %s2701_s18 = smov [#allocation2]  }
  0x3e   : > { %p2612_p8 = scmp.ne.s32.totalorder %s2829_s22, %s2611_s7  ;;  %s2616_s24 = sshll.u32 %s2701_s18, 4  ;;  %s2617_s24 = int_to_ptr.vmem [resolvable:$false] %s2616_s24 }
  0x3f   : > { %s2618_s25 = scalar_lea.vmem %s2617_s24, 128  ;;  %p2619_p3 = scmp.lt.s32.totalorder %s2829_s22, %s2617_s24 }
  0x40   : > { %p2614_p10 = pnand %p2612_p8, %p2598_p0  ;;  %p2620_p7 = scmp.lt.s32.totalorder %s2618_s25, %s2611_s7 }
  0x42   : > { %p2615_p13 = pneg %p2614_p10  ;;  %p2621_p9 = por %p2620_p7, %p2619_p3 }
  0x44   : > { %p2622_p2 = pnand %p2621_p9, %p2615_p13 }
  0x46   : > { %2625 = shalt.err (!%p2622_p2)
}
  0x47   : > { %2519 = dma.hbm_to_vmem [thread:$0]  (!%p2825_p11), %s2823_s27, 64, %s2829_s22, %s124_s28  }
  0x48   : > { %p4546_p5 = scmp.ne.s32.totalorder %s4541_s17, 0 }
  0x4a   : > { %144 = sbr.rel (%p4546_p5) target bundleno = 593 (0x251), region = 28 }
  0x51   : > { %s2859_s20 = sand.u32 1, %s2688_s10   ;;  %p4547_p0 = scmp.ne.s32.totalorder %s4539_s15, 0 }
  0x52   : > { %s1878_s26 = sshll.u32 %s2859_s20, 2  ;;  %s147_s19 = scalar_lea.sflag [#allocation3], %s2859_s20 }
  0x53   : > { %s150_s29 = scalar_lea.vmem [#allocation2], %s1878_s26 }
  0x54   : > { %2671 = dma.done.wait (%p4547_p0), %s147_s19, 64  }
  0x55   : > { %2673 = vsyncadd (%p4547_p0), %s147_s19, 4294967232  ;;  %p4548_p1 = scmp.eq.s32.totalorder %s2744_s13, 0 }
  0x57   : > { %2675 = dma.done.wait (%p4548_p1), [#allocation6], 256   ;;  %p4549_p11 = pmov %p4548_p1 }
  0x58   : > { %v178_v0 = vlaneseq  ;;  %v4350_v1 = vmov 0.0   ;;  %v177_v15 = vld [vmem:[%s150_s29] sm:$0xf]  ;;  %v2903_v24 = vld [vmem:[#allocation5] sm:$0xff]  ;;  %v4551_v31 = vmov 0  ;;  %v4556_v37 = vmov 0 }
  0x59   : > { %2677 = vsyncadd (%p4549_p11), [#allocation6], 4294967040  ;;  %405 = vmatprep.mubr.f32.mxu0 %v4350_v1  ;;  %1117 = vmatprep.mubr.f32.mxu1 %v4350_v1  ;;  %v2912_v28 = vand.u32 4294901760, %v2903_v24  ;;  %v4324_v34 = vmov 1.0|1.0   ;;  %v4561_v42 = vmov 0 }
  0x5a   : > { %v179_v2 = vshrl.u32 %v178_v0, 7  ;;  %v4566_v47 = vmov 0  ;;  %v4571_v54 = vmov 0  ;;  %v4574_v59 = vmov 0  ;;  %s1880_s15 = sshll.u32 %s2859_s20, 6  ;;  %s2079_s22 = sshll.u32 %s2744_s13, 9 }
  0x5b   : > { %4550 = vst [vmem:[#allocation11_spill] sm:$0xff] %v2912_v28  ;;  %s174_s17 = scalar_lea.vmem [#allocation7], %s1880_s15  ;;  %s4268_s30 = scalar_lea.hbm %s4314_s2, %s2079_s22 }
  0x5c   : > { %v180_v3 = vadd.s32 8, %v179_v2  ;;  %v201_v4 = vsub.s32 1, %v179_v2  ;;  %v209_v5 = vsub.s32 3, %v179_v2  ;;  %v197_v6 = vsub.s32 0, %v179_v2  ;;  %s1787_s27 = sshll.u32 %s174_s17, 4  ;;  %s1774_s13 = scalar_lea.sflag [#allocation4], %s2859_s20  ;;  %s4263_s27 = int_to_ptr.vmem [resolvable:$true] %s1787_s27 }
  0x5d   : > { %v205_v7 = vsub.s32 2, %v179_v2  ;;  %v2873_v8 = vadd.s32 16, %v179_v2  ;;  %v2875_v9 = vadd.s32 24, %v179_v2  ;;  %v2877_v10 = vadd.s32 32, %v179_v2  ;;  %s2626_s3 = scalar_lea.vmem %s4263_s27, 1024  ;;  %s2704_s4 = smov [#allocation7]  }
  0x5e   : > { %v2879_v11 = vadd.s32 40, %v179_v2  ;;  %v2881_v12 = vadd.s32 48, %v179_v2  ;;  %v2883_v13 = vadd.s32 56, %v179_v2  ;;  %v2885_v14 = vadd.s32 64, %v179_v2  ;;  %p2627_p4 = scmp.ne.s32.totalorder %s4263_s27, %s2626_s3  ;;  %s2630_s5 = sshll.u32 %s2704_s4, 4  ;;  %s2631_s5 = int_to_ptr.vmem [resolvable:$false] %s2630_s5 }
  0x5f   : > { %v2887_v16 = vadd.s32 72, %v179_v2  ;;  %v2889_v17 = vadd.s32 80, %v179_v2  ;;  %v2891_v18 = vadd.s32 88, %v179_v2  ;;  %v2893_v19 = vadd.s32 96, %v179_v2  ;;  %s2632_s6 = scalar_lea.vmem %s2631_s5, 2048  ;;  %p2633_p10 = scmp.lt.s32.totalorder %s4263_s27, %s2631_s5 }
  0x60   : > { %v2895_v20 = vrot.slane %v177_v15, %v201_v4  ;;  %v2897_v21 = vrot.slane %v177_v15, %v209_v5  ;;  %v2899_v22 = vrot.slane %v177_v15, %v197_v6  ;;  %v2901_v23 = vrot.slane %v177_v15, %v205_v7  ;;  %p2628_p6 = pnand %p2627_p4, %p2814_p12  ;;  %p2634_p13 = scmp.lt.s32.totalorder %s2632_s6, %s2626_s3 }
  0x61   : > { %v2905_v25 = vadd.s32 104, %v179_v2  ;;  %v2907_v26 = vadd.s32 112, %v179_v2  ;;  %v2909_v27 = vadd.s32 120, %v179_v2  ;;  %v4595_v6 = vmov 0 }
  0x62   : > { %vm212_vm0 = vcmp.eq.s32.totalorder %v179_v2, %v2895_v20  ;;  %vm216_vm1 = vcmp.eq.s32.totalorder %v180_v3, %v2895_v20  ;;  %vm214_vm2 = vcmp.eq.s32.totalorder %v179_v2, %v2897_v21  ;;  %vm218_vm3 = vcmp.eq.s32.totalorder %v180_v3, %v2897_v21  ;;  %p2629_p8 = pneg %p2628_p6  ;;  %p2635_p3 = por %p2634_p13, %p2633_p10 }
  0x63   : > { %v276_v29 = vsel %vm212_vm0, 1.0, %v4350_v1  ;;  %v280_v30 = vsel %vm216_vm1, 1.0, %v4350_v1  ;;  %vm2920_vm4 = vmpackc.low %vm216_vm1, %vm212_vm0  ;;  %v278_v32 = vsel %vm214_vm2, 1.0, %v4350_v1  ;;  %v282_v33 = vsel %vm218_vm3, 1.0, %v4350_v1 }
  0x64   : > { %v4552_v31 = vsel %vm2920_vm4, 4294967295, %v4551_v31  ;;  %2081 = vmatprep.subr.msk.bf16.mxu0 %vm2920_vm4, %v4324_v34  ;;  %v2929_v35 = vsub.f32 %v276_v29, %v276_v29  ;;  %v2931_v36 = vsub.f32 %v280_v30, %v280_v30  ;;  %vm2933_vm5 = vmpackc.low %vm218_vm3, %vm214_vm2  ;;  %v2937_v38 = vsub.f32 %v278_v32, %v278_v32  ;;  %p2636_p7 = pnand %p2635_p3, %p2629_p8 }
  0x65   : > { %4553 = vst [vmem:[#allocation12_spill] sm:$0xff] %v4552_v31  ;;  %v4557_v37 = vsel %vm2933_vm5, 4294967295, %v4556_v37  ;;  %v2939_v39 = vsub.f32 %v282_v33, %v282_v33  ;;  %2273 = vmatprep.subr.msk.bf16.mxu1 %vm2933_vm5, %v4324_v34  ;;  %vm211_vm6 = vcmp.eq.s32.totalorder %v179_v2, %v2899_v22  ;;  %vm215_vm7 = vcmp.eq.s32.totalorder %v180_v3, %v2899_v22 }
  0x66   : > { %4554 = vst [vmem:[#allocation13_spill] sm:$0xff] %v2929_v35  ;;  %4555 = vst [vmem:[#allocation14_spill] sm:$0xff] %v2931_v36  ;;  %vm213_vm8 = vcmp.eq.s32.totalorder %v179_v2, %v2901_v23  ;;  %vm217_vm9 = vcmp.eq.s32.totalorder %v180_v3, %v2901_v23  ;;  %v275_v40 = vsel %vm211_vm6, 1.0, %v4350_v1  ;;  %v279_v41 = vsel %vm215_vm7, 1.0, %v4350_v1 }
  0x67   : > { %4558 = vst [vmem:[#allocation15_spill] sm:$0xff] %v4557_v37  ;;  %4559 = vst [vmem:[#allocation16_spill] sm:$0xff] %v2937_v38  ;;  %v277_v43 = vsel %vm213_vm8, 1.0, %v4350_v1  ;;  %v281_v44 = vsel %vm217_vm9, 1.0, %v4350_v1  ;;  %v2959_v45 = vsub.f32 %v275_v40, %v275_v40  ;;  %v2961_v46 = vsub.f32 %v279_v41, %v279_v41 }
  0x68   : > { %4560 = vst [vmem:[#allocation17_spill] sm:$0xff] %v2939_v39  ;;  %vm2950_vm10 = vmpackc.low %vm215_vm7, %vm211_vm6  ;;  %v2967_v48 = vsub.f32 %v277_v43, %v277_v43  ;;  %v2969_v49 = vsub.f32 %v281_v44, %v281_v44  ;;  %vm220_vm12 = vcmp.eq.s32.totalorder %v2873_v8, %v2895_v20  ;;  %vm224_vm13 = vcmp.eq.s32.totalorder %v2875_v9, %v2895_v20 }
  0x69   : > { %v4562_v42 = vsel %vm2950_vm10, 4294967295, %v4561_v42  ;;  %2083 = vmatpush1.bf16.msk.msra.mxu0 %vm2950_vm10, %v4324_v34  ;;  %4564 = vst [vmem:[#allocation19_spill] sm:$0xff] %v2959_v45  ;;  %4565 = vst [vmem:[#allocation20_spill] sm:$0xff] %v2961_v46  ;;  %vm222_vm14 = vcmp.eq.s32.totalorder %v2873_v8, %v2897_v21  ;;  %vm226_vm15 = vcmp.eq.s32.totalorder %v2875_v9, %v2897_v21  ;;  %v4321_v50 = vand.u32 4294901760, %v2959_v45 }
  0x6a   : > { %4563 = vst [vmem:[#allocation18_spill] sm:$0xff] %v4562_v42  ;;  %vm2963_vm11 = vmpackc.low %vm217_vm9, %vm213_vm8  ;;  %v4320_v51 = vand.u32 4294901760, %v2961_v46  ;;  %v4319_v52 = vand.u32 4294901760, %v2967_v48  ;;  %v4318_v53 = vand.u32 4294901760, %v2969_v49  ;;  %v284_v55 = vsel %vm220_vm12, 1.0, %v4350_v1 }
  0x6b   : > { %v4567_v47 = vsel %vm2963_vm11, 4294967295, %v4566_v47  ;;  %4569 = vst [vmem:[#allocation22_spill] sm:$0xff] %v2967_v48  ;;  %4570 = vst [vmem:[#allocation23_spill] sm:$0xff] %v2969_v49  ;;  %2275 = vmatpush1.bf16.msk.msra.mxu1 %vm2963_vm11, %v4324_v34  ;;  %v288_v56 = vsel %vm224_vm13, 1.0, %v4350_v1  ;;  %v286_v57 = vsel %vm222_vm14, 1.0, %v4350_v1  ;;  %v290_v58 = vsel %vm226_vm15, 1.0, %v4350_v1 }
  0x6c   : > { %4568 = vst [vmem:[#allocation21_spill] sm:$0xff] %v4567_v47  ;;  %vm2986_vm0 = vmpackc.low %vm224_vm13, %vm220_vm12  ;;  %v3004_v60 = vsub.f32 %v2959_v45, %v4321_v50  ;;  %v3009_v61 = vsub.f32 %v2961_v46, %v4320_v51  ;;  %v3014_v62 = vsub.f32 %v2967_v48, %v4319_v52  ;;  %v3019_v63 = vsub.f32 %v2969_v49, %v4318_v53 }
  0x6d   : > { %v4572_v54 = vsel %vm2986_vm0, 4294967295, %v4571_v54  ;;  %2085 = vmatprep.subr.msk.bf16.mxu0 %vm2986_vm0, %v4324_v34  ;;  %vm2997_vm1 = vmpackc.low %vm226_vm15, %vm222_vm14  ;;  %v3024_v0 = vsub.f32 %v284_v55, %v284_v55  ;;  %v3026_v2 = vsub.f32 %v288_v56, %v288_v56  ;;  %v3028_v3 = vsub.f32 %v286_v57, %v286_v57 }
  0x6e   : > { %4573 = vst [vmem:[#allocation24_spill] sm:$0xff] %v4572_v54  ;;  %v4575_v59 = vsel %vm2997_vm1, 4294967295, %v4574_v59  ;;  %2277 = vmatprep.subr.msk.bf16.mxu1 %vm2997_vm1, %v4324_v34  ;;  %v3030_v4 = vsub.f32 %v290_v58, %v290_v58  ;;  %vm219_vm2 = vcmp.eq.s32.totalorder %v2873_v8, %v2899_v22  ;;  %vm223_vm3 = vcmp.eq.s32.totalorder %v2875_v9, %v2899_v22 }
  0x6f   : > { %4576 = vst [vmem:[#allocation25_spill] sm:$0xff] %v4575_v59  ;;  %vm221_vm6 = vcmp.eq.s32.totalorder %v2873_v8, %v2901_v23  ;;  %vm225_vm7 = vcmp.eq.s32.totalorder %v2875_v9, %v2901_v23  ;;  %v283_v29 = vsel %vm219_vm2, 1.0, %v4350_v1  ;;  %v287_v30 = vsel %vm223_vm3, 1.0, %v4350_v1  ;;  %vm3046_vm8 = vmpackc.low %vm223_vm3, %vm219_vm2 }
  0x70   : > { %v4577_v32 = vmov 0  ;;  %v285_v33 = vsel %vm221_vm6, 1.0, %v4350_v1  ;;  %v289_v40 = vsel %vm225_vm7, 1.0, %v4350_v1  ;;  %2087 = vmatpush1.bf16.msk.msra.mxu0 %vm3046_vm8, %v4324_v34  ;;  %v3055_v8 = vsub.f32 %v283_v29, %v283_v29  ;;  %vm3059_vm9 = vmpackc.low %vm225_vm7, %vm221_vm6 }
  0x71   : > { %v4578_v32 = vsel %vm3046_vm8, 4294967295, %v4577_v32  ;;  %v3057_v41 = vsub.f32 %v287_v30, %v287_v30  ;;  %v4580_v9 = vmov 0  ;;  %v3063_v43 = vsub.f32 %v285_v33, %v285_v33  ;;  %2279 = vmatpush1.bf16.msk.msra.mxu1 %vm3059_vm9, %v4324_v34 }
  0x72   : > { %4579 = vst [vmem:[#allocation26_spill] sm:$0xff] %v4578_v32  ;;  %v4581_v9 = vsel %vm3059_vm9, 4294967295, %v4580_v9  ;;  %v3065_v44 = vsub.f32 %v289_v40, %v289_v40  ;;  %vm228_vm12 = vcmp.eq.s32.totalorder %v2877_v10, %v2895_v20  ;;  %vm232_vm13 = vcmp.eq.s32.totalorder %v2879_v11, %v2895_v20 }
  0x73   : > { %4582 = vst [vmem:[#allocation27_spill] sm:$0xff] %v4581_v9  ;;  %vm230_vm14 = vcmp.eq.s32.totalorder %v2877_v10, %v2897_v21  ;;  %vm234_vm15 = vcmp.eq.s32.totalorder %v2879_v11, %v2897_v21  ;;  %vm3082_vm2 = vmpackc.low %vm232_vm13, %vm228_vm12  ;;  %v4583_v29 = vmov 0  ;;  %v292_v30 = vsel %vm228_vm12, 1.0, %v4350_v1 }
  0x74   : > { %v4584_v29 = vsel %vm3082_vm2, 4294967295, %v4583_v29  ;;  %v296_v33 = vsel %vm232_vm13, 1.0, %v4350_v1  ;;  %2089 = vmatprep.subr.msk.bf16.mxu0 %vm3082_vm2, %v4324_v34  ;;  %v294_v40 = vsel %vm230_vm14, 1.0, %v4350_v1  ;;  %v298_v53 = vsel %vm234_vm15, 1.0, %v4350_v1  ;;  %vm3093_vm3 = vmpackc.low %vm234_vm15, %vm230_vm14 }
  0x75   : > { %4585 = vst [vmem:[#allocation28_spill] sm:$0xff] %v4584_v29  ;;  %v4586_v52 = vmov 0  ;;  %v3097_v51 = vsub.f32 %v292_v30, %v292_v30  ;;  %v3099_v50 = vsub.f32 %v296_v33, %v296_v33  ;;  %2281 = vmatprep.subr.msk.bf16.mxu1 %vm3093_vm3, %v4324_v34  ;;  %v3104_v58 = vsub.f32 %v294_v40, %v294_v40 }
  0x76   : > { %v4587_v52 = vsel %vm3093_vm3, 4294967295, %v4586_v52  ;;  %v3106_v57 = vsub.f32 %v298_v53, %v298_v53  ;;  %vm227_vm6 = vcmp.eq.s32.totalorder %v2877_v10, %v2899_v22  ;;  %vm231_vm7 = vcmp.eq.s32.totalorder %v2879_v11, %v2899_v22 }
  0x77   : > { %4588 = vst [vmem:[#allocation29_spill] sm:$0xff] %v4587_v52  ;;  %vm229_vm12 = vcmp.eq.s32.totalorder %v2877_v10, %v2901_v23  ;;  %vm233_vm13 = vcmp.eq.s32.totalorder %v2879_v11, %v2901_v23  ;;  %v291_v30 = vsel %vm227_vm6, 1.0, %v4350_v1  ;;  %v295_v33 = vsel %vm231_vm7, 1.0, %v4350_v1  ;;  %vm3118_vm14 = vmpackc.low %vm231_vm7, %vm227_vm6 }
  0x78   : > { %v4589_v40 = vmov 0  ;;  %v293_v53 = vsel %vm229_vm12, 1.0, %v4350_v1  ;;  %v297_v56 = vsel %vm233_vm13, 1.0, %v4350_v1  ;;  %2091 = vmatpush1.bf16.msk.msra.mxu0 %vm3118_vm14, %v4324_v34  ;;  %v3127_v10 = vsub.f32 %v291_v30, %v291_v30  ;;  %vm3131_vm15 = vmpackc.low %vm233_vm13, %vm229_vm12 }
  0x79   : > { %v4590_v40 = vsel %vm3118_vm14, 4294967295, %v4589_v40  ;;  %v3129_v55 = vsub.f32 %v295_v33, %v295_v33  ;;  %v4592_v11 = vmov 0  ;;  %v3135_v15 = vsub.f32 %v293_v53, %v293_v53  ;;  %2283 = vmatpush1.bf16.msk.msra.mxu1 %vm3131_vm15, %v4324_v34 }
  0x7a   : > { %4591 = vst [vmem:[#allocation30_spill] sm:$0xff] %v4590_v40  ;;  %v4593_v11 = vsel %vm3131_vm15, 4294967295, %v4592_v11  ;;  %v3137_v7 = vsub.f32 %v297_v56, %v297_v56  ;;  %vm236_vm6 = vcmp.eq.s32.totalorder %v2881_v12, %v2895_v20  ;;  %vm240_vm7 = vcmp.eq.s32.totalorder %v2883_v13, %v2895_v20 }
  0x7b   : > { %4594 = vst [vmem:[#allocation31_spill] sm:$0xff] %v4593_v11  ;;  %vm238_vm12 = vcmp.eq.s32.totalorder %v2881_v12, %v2897_v21  ;;  %vm242_vm13 = vcmp.eq.s32.totalorder %v2883_v13, %v2897_v21  ;;  %vm3154_vm15 = vmpackc.low %vm240_vm7, %vm236_vm6  ;;  %v300_v5 = vsel %vm236_vm6, 1.0, %v4350_v1  ;;  %v304_v34 = vsel %vm240_vm7, 1.0, %v4350_v1 }
  0x7c   : > { %v4596_v6 = vsel %vm3154_vm15, 4294967295, %v4595_v6  ;;  %v4598_v11 = vmov 1.0|1.0   ;;  %v302_v30 = vsel %vm238_vm12, 1.0, %v4350_v1  ;;  %v306_v56 = vsel %vm242_vm13, 1.0, %v4350_v1  ;;  %vm3165_vm14 = vmpackc.low %vm242_vm13, %vm238_vm12 }
  0x7d   : > { %4597 = vst [vmem:[#allocation32_spill] sm:$0xff] %v4596_v6  ;;  %2093 = vmatprep.subr.msk.bf16.mxu0 %vm3154_vm15, %v4598_v11  ;;  %v4599_v33 = vmov 0  ;;  %v3169_v53 = vsub.f32 %v300_v5, %v300_v5  ;;  %v3171_v40 = vsub.f32 %v304_v34, %v304_v34  ;;  %2285 = vmatprep.subr.msk.bf16.mxu1 %vm3165_vm14, %v4598_v11 }
  0x7e   : > { %v4600_v33 = vsel %vm3165_vm14, 4294967295, %v4599_v33  ;;  %v3176_v52 = vsub.f32 %v302_v30, %v302_v30  ;;  %v3178_v6 = vsub.f32 %v306_v56, %v306_v56  ;;  %vm235_vm6 = vcmp.eq.s32.totalorder %v2881_v12, %v2899_v22 }
  0x7f   : > { %4601 = vst [vmem:[#allocation33_spill] sm:$0xff] %v4600_v33  ;;  %vm239_vm7 = vcmp.eq.s32.totalorder %v2883_v13, %v2899_v22  ;;  %vm237_vm12 = vcmp.eq.s32.totalorder %v2881_v12, %v2901_v23  ;;  %vm241_vm13 = vcmp.eq.s32.totalorder %v2883_v13, %v2901_v23  ;;  %v299_v34 = vsel %vm235_vm6, 1.0, %v4350_v1 }
  0x80   : > { %v303_v5 = vsel %vm239_vm7, 1.0, %v4350_v1  ;;  %vm3190_vm14 = vmpackc.low %vm239_vm7, %vm235_vm6  ;;  %v4602_v30 = vmov 0  ;;  %v301_v56 = vsel %vm237_vm12, 1.0, %v4350_v1  ;;  %v305_v33 = vsel %vm241_vm13, 1.0, %v4350_v1 }
  0x81   : > { %v4603_v30 = vsel %vm3190_vm14, 4294967295, %v4602_v30  ;;  %2095 = vmatpush1.bf16.msk.msra.mxu0 %vm3190_vm14, %v4598_v11  ;;  %v3199_v12 = vsub.f32 %v299_v34, %v299_v34  ;;  %v3201_v29 = vsub.f32 %v303_v5, %v303_v5  ;;  %vm3203_vm15 = vmpackc.low %vm241_vm13, %vm237_vm12  ;;  %v4605_v13 = vmov 0 }
  0x82   : > { %4604 = vst [vmem:[#allocation34_spill] sm:$0xff] %v4603_v30  ;;  %v4606_v13 = vsel %vm3203_vm15, 4294967295, %v4605_v13  ;;  %v3207_v9 = vsub.f32 %v301_v56, %v301_v56  ;;  %v3209_v32 = vsub.f32 %v305_v33, %v305_v33  ;;  %2287 = vmatpush1.bf16.msk.msra.mxu1 %vm3203_vm15, %v4598_v11  ;;  %vm244_vm6 = vcmp.eq.s32.totalorder %v2885_v14, %v2895_v20 }
  0x83   : > { %4607 = vst [vmem:[#allocation35_spill] sm:$0xff] %v4606_v13  ;;  %vm248_vm7 = vcmp.eq.s32.totalorder %v2887_v16, %v2895_v20  ;;  %vm246_vm12 = vcmp.eq.s32.totalorder %v2885_v14, %v2897_v21  ;;  %vm250_vm13 = vcmp.eq.s32.totalorder %v2887_v16, %v2897_v21  ;;  %v4608_v1 = vmov 0 }
  0x84   : > { %vm3226_vm15 = vmpackc.low %vm248_vm7, %vm244_vm6  ;;  %v4611_v13 = vmov 0.0   ;;  %v4612_v5 = vmov 0 }
  0x85   : > { %v4609_v1 = vsel %vm3226_vm15, 4294967295, %v4608_v1  ;;  %v308_v30 = vsel %vm244_vm6, 1.0, %v4611_v13  ;;  %v312_v59 = vsel %vm248_vm7, 1.0, %v4611_v13  ;;  %2097 = vmatprep.subr.msk.bf16.mxu0 %vm3226_vm15, %v4598_v11  ;;  %v310_v34 = vsel %vm246_vm12, 1.0, %v4611_v13  ;;  %vm3237_vm14 = vmpackc.low %vm250_vm13, %vm246_vm12 }
  0x86   : > { %4610 = vst [vmem:[#allocation36_spill] sm:$0xff] %v4609_v1  ;;  %v314_v33 = vsel %vm250_vm13, 1.0, %v4611_v13  ;;  %v4613_v5 = vsel %vm3237_vm14, 4294967295, %v4612_v5  ;;  %v3241_v56 = vsub.f32 %v308_v30, %v308_v30  ;;  %v3243_v54 = vsub.f32 %v312_v59, %v312_v59  ;;  %2289 = vmatprep.subr.msk.bf16.mxu1 %vm3237_vm14, %v4598_v11 }
  0x87   : > { %4614 = vst [vmem:[#allocation37_spill] sm:$0xff] %v4613_v5  ;;  %v3248_v47 = vsub.f32 %v310_v34, %v310_v34  ;;  %v3250_v1 = vsub.f32 %v314_v33, %v314_v33  ;;  %vm243_vm6 = vcmp.eq.s32.totalorder %v2885_v14, %v2899_v22  ;;  %vm247_vm7 = vcmp.eq.s32.totalorder %v2887_v16, %v2899_v22 }
  0x88   : > { %vm245_vm12 = vcmp.eq.s32.totalorder %v2885_v14, %v2901_v23  ;;  %vm249_vm13 = vcmp.eq.s32.totalorder %v2887_v16, %v2901_v23  ;;  %v307_v59 = vsel %vm243_vm6, 1.0, %v4611_v13  ;;  %v311_v30 = vsel %vm247_vm7, 1.0, %v4611_v13  ;;  %vm3262_vm14 = vmpackc.low %vm247_vm7, %vm243_vm6 }
  0x89   : > { %v4615_v34 = vmov 0  ;;  %v309_v33 = vsel %vm245_vm12, 1.0, %v4611_v13  ;;  %v313_v5 = vsel %vm249_vm13, 1.0, %v4611_v13  ;;  %2099 = vmatpush1.bf16.msk.msra.mxu0 %vm3262_vm14, %v4598_v11  ;;  %v3271_v14 = vsub.f32 %v307_v59, %v307_v59  ;;  %vm3275_vm15 = vmpackc.low %vm249_vm13, %vm245_vm12 }
  0x8a   : > { %v4616_v34 = vsel %vm3262_vm14, 4294967295, %v4615_v34  ;;  %v3273_v42 = vsub.f32 %v311_v30, %v311_v30  ;;  %v4619_v16 = vmov 0  ;;  %v3279_v37 = vsub.f32 %v309_v33, %v309_v33  ;;  %2291 = vmatpush1.bf16.msk.msra.mxu1 %vm3275_vm15, %v4598_v11 }
  0x8b   : > { %4617 = vst [vmem:[#allocation38_spill] sm:$0xff] %v4616_v34  ;;  %v4620_v16 = vsel %vm3275_vm15, 4294967295, %v4619_v16  ;;  %v3281_v31 = vsub.f32 %v313_v5, %v313_v5  ;;  %vm252_vm6 = vcmp.eq.s32.totalorder %v2889_v17, %v2895_v20  ;;  %vm256_vm7 = vcmp.eq.s32.totalorder %v2891_v18, %v2895_v20 }
  0x8c   : > { %4618 = vst [vmem:[#allocation39_spill] sm:$0xff] %v3273_v42  ;;  %4621 = vst [vmem:[#allocation40_spill] sm:$0xff] %v4620_v16  ;;  %vm254_vm12 = vcmp.eq.s32.totalorder %v2889_v17, %v2897_v21  ;;  %vm258_vm13 = vcmp.eq.s32.totalorder %v2891_v18, %v2897_v21  ;;  %v4622_v16 = vmov 0  ;;  %v316_v34 = vsel %vm252_vm6, 1.0, %v4611_v13 }
  0x8d   : > { %vm3298_vm15 = vmpackc.low %vm256_vm7, %vm252_vm6  ;;  %v320_v49 = vsel %vm256_vm7, 1.0, %v4611_v13  ;;  %v318_v59 = vsel %vm254_vm12, 1.0, %v4611_v13  ;;  %v322_v5 = vsel %vm258_vm13, 1.0, %v4611_v13  ;;  %v4625_v30 = vmov 0 }
  0x8e   : > { %v4623_v16 = vsel %vm3298_vm15, 4294967295, %v4622_v16  ;;  %2101 = vmatprep.subr.msk.bf16.mxu0 %vm3298_vm15, %v4598_v11  ;;  %vm3309_vm14 = vmpackc.low %vm258_vm13, %vm254_vm12  ;;  %v3313_v33 = vsub.f32 %v316_v34, %v316_v34  ;;  %v3315_v48 = vsub.f32 %v320_v49, %v320_v49  ;;  %v3320_v46 = vsub.f32 %v318_v59, %v318_v59 }
  0x8f   : > { %4624 = vst [vmem:[#allocation41_spill] sm:$0xff] %v4623_v16  ;;  %v4626_v30 = vsel %vm3309_vm14, 4294967295, %v4625_v30  ;;  %2293 = vmatprep.subr.msk.bf16.mxu1 %vm3309_vm14, %v4598_v11  ;;  %v3322_v16 = vsub.f32 %v322_v5, %v322_v5  ;;  %vm251_vm6 = vcmp.eq.s32.totalorder %v2889_v17, %v2899_v22  ;;  %vm255_vm7 = vcmp.eq.s32.totalorder %v2891_v18, %v2899_v22 }
  0x90   : > { %4627 = vst [vmem:[#allocation42_spill] sm:$0xff] %v4626_v30  ;;  %4628 = vst [vmem:[#allocation43_spill] sm:$0xff] %v3315_v48  ;;  %vm253_vm12 = vcmp.eq.s32.totalorder %v2889_v17, %v2901_v23  ;;  %vm257_vm13 = vcmp.eq.s32.totalorder %v2891_v18, %v2901_v23  ;;  %v315_v49 = vsel %vm251_vm6, 1.0, %v4611_v13  ;;  %v319_v34 = vsel %vm255_vm7, 1.0, %v4611_v13 }
  0x91   : > { %4629 = vst [vmem:[#allocation44_spill] sm:$0xff] %v3320_v46  ;;  %4630 = vst [vmem:[#allocation45_spill] sm:$0xff] %v3322_v16  ;;  %v4631_v59 = vmov 0  ;;  %v317_v5 = vsel %vm253_vm12, 1.0, %v4611_v13  ;;  %v321_v30 = vsel %vm257_vm13, 1.0, %v4611_v13  ;;  %v3343_v17 = vsub.f32 %v315_v49, %v315_v49 }
  0x92   : > { %vm3334_vm14 = vmpackc.low %vm255_vm7, %vm251_vm6  ;;  %v3345_v45 = vsub.f32 %v319_v34, %v319_v34  ;;  %v4636_v18 = vmov 0  ;;  %v3351_v16 = vsub.f32 %v317_v5, %v317_v5  ;;  %v3353_v46 = vsub.f32 %v321_v30, %v321_v30 }
  0x93   : > { %v4632_v59 = vsel %vm3334_vm14, 4294967295, %v4631_v59  ;;  %2103 = vmatpush1.bf16.msk.msra.mxu0 %vm3334_vm14, %v4598_v11  ;;  %4634 = vst [vmem:[#allocation47_spill] sm:$0xff] %v3343_v17  ;;  %vm3347_vm15 = vmpackc.low %vm257_vm13, %vm253_vm12  ;;  %vm260_vm6 = vcmp.eq.s32.totalorder %v2893_v19, %v2895_v20  ;;  %vm264_vm7 = vcmp.eq.s32.totalorder %v2905_v25, %v2895_v20  ;;  %vm262_vm12 = vcmp.eq.s32.totalorder %v2893_v19, %v2897_v21 }
  0x94   : > { %4633 = vst [vmem:[#allocation46_spill] sm:$0xff] %v4632_v59  ;;  %4635 = vst [vmem:[#allocation48_spill] sm:$0xff] %v3345_v45  ;;  %v4637_v18 = vsel %vm3347_vm15, 4294967295, %v4636_v18  ;;  %2295 = vmatpush1.bf16.msk.msra.mxu1 %vm3347_vm15, %v4598_v11  ;;  %vm266_vm13 = vcmp.eq.s32.totalorder %v2905_v25, %v2897_v21  ;;  %v324_v59 = vsel %vm260_vm6, 1.0, %v4611_v13  ;;  %v328_v48 = vsel %vm264_vm7, 1.0, %v4611_v13 }
  0x95   : > { %4638 = vst [vmem:[#allocation49_spill] sm:$0xff] %v4637_v18  ;;  %4639 = vst [vmem:[#allocation50_spill] sm:$0xff] %v3351_v16  ;;  %v4641_v18 = vmov 0  ;;  %v326_v49 = vsel %vm262_vm12, 1.0, %v4611_v13  ;;  %v330_v30 = vsel %vm266_vm13, 1.0, %v4611_v13  ;;  %v4644_v34 = vmov 0 }
  0x96   : > { %4640 = vst [vmem:[#allocation51_spill] sm:$0xff] %v3353_v46  ;;  %vm3370_vm15 = vmpackc.low %vm264_vm7, %vm260_vm6  ;;  %v3385_v5 = vsub.f32 %v324_v59, %v324_v59  ;;  %v3387_v46 = vsub.f32 %v328_v48, %v328_v48  ;;  %v3392_v16 = vsub.f32 %v326_v49, %v326_v49  ;;  %vm259_vm6 = vcmp.eq.s32.totalorder %v2893_v19, %v2899_v22 }
  0x97   : > { %v4642_v18 = vsel %vm3370_vm15, 4294967295, %v4641_v18  ;;  %2105 = vmatprep.subr.msk.bf16.mxu0 %vm3370_vm15, %v4598_v11  ;;  %vm3381_vm14 = vmpackc.low %vm266_vm13, %vm262_vm12  ;;  %vm263_vm7 = vcmp.eq.s32.totalorder %v2905_v25, %v2899_v22  ;;  %vm261_vm12 = vcmp.eq.s32.totalorder %v2893_v19, %v2901_v23  ;;  %vm265_vm13 = vcmp.eq.s32.totalorder %v2905_v25, %v2901_v23 }
  0x98   : > { %4643 = vst [vmem:[#allocation52_spill] sm:$0xff] %v4642_v18  ;;  %v4645_v34 = vsel %vm3381_vm14, 4294967295, %v4644_v34  ;;  %4647 = vst [vmem:[#allocation54_spill] sm:$0xff] %v3387_v46  ;;  %2297 = vmatprep.subr.msk.bf16.mxu1 %vm3381_vm14, %v4598_v11  ;;  %v3394_v18 = vsub.f32 %v330_v30, %v330_v30  ;;  %v323_v48 = vsel %vm259_vm6, 1.0, %v4611_v13  ;;  %v327_v59 = vsel %vm263_vm7, 1.0, %v4611_v13 }
  0x99   : > { %4646 = vst [vmem:[#allocation53_spill] sm:$0xff] %v4645_v34  ;;  %4648 = vst [vmem:[#allocation55_spill] sm:$0xff] %v3392_v16  ;;  %v4650_v49 = vmov 0  ;;  %v325_v30 = vsel %vm261_vm12, 1.0, %v4611_v13  ;;  %v329_v34 = vsel %vm265_vm13, 1.0, %v4611_v13  ;;  %v3415_v19 = vsub.f32 %v323_v48, %v323_v48 }
  0x9a   : > { %4649 = vst [vmem:[#allocation56_spill] sm:$0xff] %v3394_v18  ;;  %vm3406_vm14 = vmpackc.low %vm263_vm7, %vm259_vm6  ;;  %v3417_v18 = vsub.f32 %v327_v59, %v327_v59  ;;  %v4655_v25 = vmov 0  ;;  %v3423_v16 = vsub.f32 %v325_v30, %v325_v30  ;;  %v3425_v46 = vsub.f32 %v329_v34, %v329_v34 }
  0x9b   : > { %v4651_v49 = vsel %vm3406_vm14, 4294967295, %v4650_v49  ;;  %2107 = vmatpush1.bf16.msk.msra.mxu0 %vm3406_vm14, %v4598_v11  ;;  %4653 = vst [vmem:[#allocation58_spill] sm:$0xff] %v3415_v19  ;;  %vm3419_vm15 = vmpackc.low %vm265_vm13, %vm261_vm12  ;;  %vm268_vm6 = vcmp.eq.s32.totalorder %v2907_v26, %v2895_v20  ;;  %vm272_vm7 = vcmp.eq.s32.totalorder %v2909_v27, %v2895_v20  ;;  %vm270_vm12 = vcmp.eq.s32.totalorder %v2907_v26, %v2897_v21 }
  0x9c   : > { %4652 = vst [vmem:[#allocation57_spill] sm:$0xff] %v4651_v49  ;;  %4654 = vst [vmem:[#allocation59_spill] sm:$0xff] %v3417_v18  ;;  %v4656_v25 = vsel %vm3419_vm15, 4294967295, %v4655_v25  ;;  %2299 = vmatpush1.bf16.msk.msra.mxu1 %vm3419_vm15, %v4598_v11  ;;  %vm274_vm13 = vcmp.eq.s32.totalorder %v2909_v27, %v2897_v21  ;;  %v332_v20 = vsel %vm268_vm6, 1.0, %v4611_v13  ;;  %v336_v49 = vsel %vm272_vm7, 1.0, %v4611_v13 }
  0x9d   : > { %4657 = vst [vmem:[#allocation60_spill] sm:$0xff] %v4656_v25  ;;  %4658 = vst [vmem:[#allocation61_spill] sm:$0xff] %v3425_v46  ;;  %v4659_v25 = vmov 0  ;;  %v334_v21 = vsel %vm270_vm12, 1.0, %v4611_v13  ;;  %v338_v34 = vsel %vm274_vm13, 1.0, %v4611_v13  ;;  %v4662_v59 = vmov 0 }
  0x9e   : > { %vm3442_vm15 = vmpackc.low %vm272_vm7, %vm268_vm6  ;;  %v3457_v30 = vsub.f32 %v332_v20, %v332_v20  ;;  %v3459_v48 = vsub.f32 %v336_v49, %v336_v49  ;;  %v3464_v46 = vsub.f32 %v334_v21, %v334_v21  ;;  %vm267_vm6 = vcmp.eq.s32.totalorder %v2907_v26, %v2899_v22 }
  0x9f   : > { %v4660_v25 = vsel %vm3442_vm15, 4294967295, %v4659_v25  ;;  %2109 = vmatprep.subr.msk.bf16.mxu0 %vm3442_vm15, %v4598_v11  ;;  %vm3453_vm14 = vmpackc.low %vm274_vm13, %vm270_vm12  ;;  %vm271_vm7 = vcmp.eq.s32.totalorder %v2909_v27, %v2899_v22  ;;  %vm269_vm12 = vcmp.eq.s32.totalorder %v2907_v26, %v2901_v23  ;;  %vm273_vm13 = vcmp.eq.s32.totalorder %v2909_v27, %v2901_v23 }
  0xa0   : > { %4661 = vst [vmem:[#allocation62_spill] sm:$0xff] %v4660_v25  ;;  %v4663_v59 = vsel %vm3453_vm14, 4294967295, %v4662_v59  ;;  %4665 = vst [vmem:[#allocation64_spill] sm:$0xff] %v3457_v30  ;;  %2301 = vmatprep.subr.msk.bf16.mxu1 %vm3453_vm14, %v4598_v11  ;;  %v3466_v25 = vsub.f32 %v338_v34, %v338_v34  ;;  %v331_v49 = vsel %vm267_vm6, 1.0, %v4611_v13  ;;  %v335_v20 = vsel %vm271_vm7, 1.0, %v4611_v13 }
  0xa1   : > { %4664 = vst [vmem:[#allocation63_spill] sm:$0xff] %v4663_v59  ;;  %4666 = vst [vmem:[#allocation65_spill] sm:$0xff] %v3459_v48  ;;  %v4669_v21 = vmov 0  ;;  %v333_v34 = vsel %vm269_vm12, 1.0, %v4611_v13  ;;  %v337_v59 = vsel %vm273_vm13, 1.0, %v4611_v13  ;;  %v3487_v22 = vsub.f32 %v331_v49, %v331_v49 }
  0xa2   : > { %4667 = vst [vmem:[#allocation66_spill] sm:$0xff] %v3464_v46  ;;  %4668 = vst [vmem:[#allocation67_spill] sm:$0xff] %v3466_v25  ;;  %v3489_v26 = vsub.f32 %v335_v20, %v335_v20  ;;  %v4674_v23 = vmov 0  ;;  %v3495_v27 = vsub.f32 %v333_v34, %v333_v34  ;;  %v3497_v25 = vsub.f32 %v337_v59, %v337_v59 }
  0xa3   : > { %vm3478_vm14 = vmpackc.low %vm271_vm7, %vm267_vm6  ;;  %4672 = vst [vmem:[#allocation69_spill] sm:$0xff] %v3487_v22  ;;  %v4455_v46 = vand.u32 4294901760, %v2929_v35  ;;  %v4463_v49 = vand.u32 4294901760, %v2937_v38  ;;  %v4679_v48 = vand.u32 4294901760, %v2939_v39  ;;  %v3524_v34 = vsub.f32 %v2903_v24, %v2912_v28 }
  0xa4   : > { %v4670_v21 = vsel %vm3478_vm14, 4294967295, %v4669_v21  ;;  %2111 = vmatpush1.bf16.msk.msra.mxu0 %vm3478_vm14, %v4598_v11  ;;  %4673 = vst [vmem:[#allocation70_spill] sm:$0xff] %v3489_v26  ;;  %vm3491_vm15 = vmpackc.low %vm273_vm13, %vm269_vm12  ;;  %v4681_v59 = vand.u32 4294901760, %v3004_v60  ;;  %v4474_v60 = vand.u32 4294901760, %v3028_v3  ;;  %v4488_v28 = vand.u32 4294901760, %v3099_v50 }
  0xa5   : > { %4671 = vst [vmem:[#allocation68_spill] sm:$0xff] %v4670_v21  ;;  %v4675_v23 = vsel %vm3491_vm15, 4294967295, %v4674_v23  ;;  %4677 = vst [vmem:[#allocation72_spill] sm:$0xff] %v3495_v27  ;;  %2303 = vmatpush1.bf16.msk.msra.mxu1 %vm3491_vm15, %v4598_v11  ;;  %v4460_v21 = vand.u32 4294901760, %v2931_v36  ;;  %v1142_v20 = vsub.f32 %v2937_v38, %v4463_v49  ;;  %v1152_v30 = vsub.f32 %v2939_v39, %v4679_v48 }
  0xa6   : > { %4676 = vst [vmem:[#allocation71_spill] sm:$0xff] %v4675_v23  ;;  %4678 = vst [vmem:[#allocation73_spill] sm:$0xff] %v3497_v25  ;;  %v430_v23 = vsub.f32 %v2929_v35, %v4455_v46  ;;  %v4682_v46 = vand.u32 4294901760, %v3009_v61  ;;  %v4683_v25 = vand.u32 4294901760, %v3014_v62  ;;  %v4473_v49 = vand.u32 4294901760, %v3024_v0 }
  0xa7   : > { %v440_v11 = vsub.f32 %v2931_v36, %v4460_v21  ;;  %4680 = vst [vmem:[#allocation74_spill] sm:$0xff] %v3524_v34  ;;  %v4684_v21 = vand.u32 4294901760, %v3019_v63  ;;  %v1143_v26 = vand.u32 4294901760, %v1142_v20  ;;  %v1153_v48 = vand.u32 4294901760, %v1152_v30 }
  0xa8   : > { %v2114_v35 = vpack.c.bf16 %v4682_v46, %v4681_v59  ;;  %v431_v38 = vand.u32 4294901760, %v430_v23  ;;  %v3536_v39 = vand.u32 4294901760, %v3524_v34  ;;  %v450_v24 = vsub.f32 %v3024_v0, %v4473_v49 }
  0xa9   : > { %v2306_v36 = vpack.c.bf16 %v4684_v21, %v4683_v25  ;;  %v441_v27 = vand.u32 4294901760, %v440_v11  ;;  %v4472_v46 = vand.u32 4294901760, %v3026_v2  ;;  %v2304_v62 = vpack.c.bf16 %v1153_v48, %v1143_v26 }
  0xaa   : > { %4685 = vst [vmem:[#allocation75_spill] sm:$0xff] %v3536_v39  ;;  %v4479_v63 = vand.u32 4294901760, %v3030_v4  ;;  %v4686_v25 = vand.u32 4294901760, %v3055_v8  ;;  %v409_v30 = vsub.f32 %v3524_v34, %v3536_v39  ;;  %v451_v21 = vand.u32 4294901760, %v450_v24 }
  0xab   : > { %v2112_v61 = vpack.c.bf16 %v441_v27, %v431_v38  ;;  %v460_v23 = vsub.f32 %v3026_v2, %v4472_v46  ;;  %v1162_v20 = vsub.f32 %v3028_v3, %v4474_v60  ;;  %2305 = vmatprep.subr.bf16.mxu1 %v2304_v62  ;;  %v4687_v27 = vand.u32 4294901760, %v3057_v41 }
  0xac   : > { %v455_v11 = vsub.f32 %v3055_v8, %v4686_v25  ;;  %v1172_v38 = vsub.f32 %v3030_v4, %v4479_v63  ;;  %v4688_v48 = vand.u32 4294901760, %v3063_v43  ;;  %v410_v25 = vand.u32 4294901760, %v409_v30 }
  0xad   : > { %2113 = vmatprep.subr.bf16.mxu0 %v2112_v61  ;;  %v465_v59 = vsub.f32 %v3057_v41, %v4687_v27  ;;  %v461_v46 = vand.u32 4294901760, %v460_v23  ;;  %v1163_v49 = vand.u32 4294901760, %v1162_v20  ;;  %v4689_v60 = vand.u32 4294901760, %v3065_v44 }
  0xae   : > { %v456_v26 = vand.u32 4294901760, %v455_v11  ;;  %v1167_v24 = vsub.f32 %v3063_v43, %v4688_v48  ;;  %v1173_v62 = vand.u32 4294901760, %v1172_v38  ;;  %v4493_v11 = vand.u32 4294901760, %v3097_v51  ;;  %411 = vmatmul.mubr.f32.vlgmr.msra.gmra.mrb[0].mxu0 %v410_v25  ;;  %1123 = vmatmul.mubr.f32.vlgmr.msra.gmra.mrb[0].mxu1 %v410_v25 }
  0xaf   : > { %v1177_v61 = vsub.f32 %v3065_v44, %v4689_v60  ;;  %v466_v39 = vand.u32 4294901760, %v465_v59  ;;  %v2116_v63 = vpack.c.bf16 %v461_v46, %v451_v21  ;;  %v4483_v48 = vand.u32 4294901760, %v3104_v58  ;;  %2115 = vmatpush1.bf16.msra.mxu0 %v2114_v35  ;;  %2307 = vmatpush1.bf16.msra.mxu1 %v2306_v36 }
  0xb0   : > { %v1168_v34 = vand.u32 4294901760, %v1167_v24  ;;  %v2308_v30 = vpack.c.bf16 %v1173_v62, %v1163_v49  ;;  %v470_v60 = vsub.f32 %v3097_v51, %v4493_v11  ;;  %v4482_v20 = vand.u32 4294901760, %v3106_v57  ;;  %416 = vmatprep.mubr.f32.mxu0 %v4611_v13  ;;  %1128 = vmatprep.mubr.f32.mxu1 %v4611_v13  ;;  %v4703_v11 = vld [vmem:[#allocation44_spill] sm:$0xff] }
  0xb1   : > { %v1178_v27 = vand.u32 4294901760, %v1177_v61  ;;  %v2118_v23 = vpack.c.bf16 %v466_v39, %v456_v26  ;;  %2117 = vmatprep.subr.bf16.mxu0 %v2116_v63  ;;  %v480_v46 = vsub.f32 %v3099_v50, %v4488_v28  ;;  %v1182_v21 = vsub.f32 %v3104_v58, %v4483_v48 }
  0xb2   : > { %v4690_v35 = vand.u32 4294901760, %v3127_v10  ;;  %2309 = vmatprep.subr.bf16.mxu1 %v2308_v30  ;;  %v471_v39 = vand.u32 4294901760, %v470_v60  ;;  %v1192_v49 = vsub.f32 %v3106_v57, %v4482_v20  ;;  %v4692_v26 = vand.u32 4294901760, %v3135_v15 }
  0xb3   : > { %v2310_v38 = vpack.c.bf16 %v1178_v27, %v1168_v34  ;;  %v4691_v34 = vand.u32 4294901760, %v3129_v55  ;;  %v481_v24 = vand.u32 4294901760, %v480_v46  ;;  %v1183_v25 = vand.u32 4294901760, %v1182_v21  ;;  %2119 = vmatpush1.bf16.msra.mxu0 %v2118_v23 }
  0xb4   : > { %v475_v36 = vsub.f32 %v3127_v10, %v4690_v35  ;;  %v1187_v59 = vsub.f32 %v3135_v15, %v4692_v26  ;;  %v4693_v62 = vand.u32 4294901760, %v3137_v7  ;;  %v1193_v30 = vand.u32 4294901760, %v1192_v49 }
  0xb5   : > { %v485_v63 = vsub.f32 %v3129_v55, %v4691_v34  ;;  %2311 = vmatpush1.bf16.msra.mxu1 %v2310_v38  ;;  %v4487_v34 = vand.u32 4294901760, %v3169_v53  ;;  %v2120_v20 = vpack.c.bf16 %v481_v24, %v471_v39  ;;  %v4486_v48 = vand.u32 4294901760, %v3171_v40 }
  0xb6   : > { %v476_v61 = vand.u32 4294901760, %v475_v36  ;;  %v1197_v27 = vsub.f32 %v3137_v7, %v4693_v62  ;;  %v1188_v35 = vand.u32 4294901760, %v1187_v59  ;;  %v4484_v46 = vand.u32 4294901760, %v3176_v52 }
  0xb7   : > { %v486_v60 = vand.u32 4294901760, %v485_v63  ;;  %v2312_v21 = vpack.c.bf16 %v1193_v30, %v1183_v25  ;;  %v490_v62 = vsub.f32 %v3169_v53, %v4487_v34  ;;  %v4485_v23 = vand.u32 4294901760, %v3178_v6  ;;  %2121 = vmatprep.subr.bf16.mxu0 %v2120_v20 }
  0xb8   : > { %v1198_v26 = vand.u32 4294901760, %v1197_v27  ;;  %v500_v49 = vsub.f32 %v3171_v40, %v4486_v48  ;;  %v1202_v39 = vsub.f32 %v3176_v52, %v4484_v46  ;;  %v4694_v63 = vand.u32 4294901760, %v3199_v12 }
  0xb9   : > { %v2122_v36 = vpack.c.bf16 %v486_v60, %v476_v61  ;;  %2313 = vmatprep.subr.bf16.mxu1 %v2312_v21  ;;  %v491_v24 = vand.u32 4294901760, %v490_v62  ;;  %v1212_v20 = vsub.f32 %v3178_v6, %v4485_v23  ;;  %v4695_v25 = vand.u32 4294901760, %v3201_v29 }
  0xba   : > { %v2314_v38 = vpack.c.bf16 %v1198_v26, %v1188_v35  ;;  %v495_v59 = vsub.f32 %v3199_v12, %v4694_v63  ;;  %v4696_v27 = vand.u32 4294901760, %v3207_v9  ;;  %v501_v60 = vand.u32 4294901760, %v500_v49 }
  0xbb   : > { %2123 = vmatpush1.bf16.msra.mxu0 %v2122_v36  ;;  %v505_v61 = vsub.f32 %v3201_v29, %v4695_v25  ;;  %v1203_v35 = vand.u32 4294901760, %v1202_v39  ;;  %v4697_v21 = vand.u32 4294901760, %v3209_v32  ;;  %v1213_v62 = vand.u32 4294901760, %v1212_v20 }
  0xbc   : > { %v1207_v30 = vsub.f32 %v3207_v9, %v4696_v27  ;;  %2315 = vmatpush1.bf16.msra.mxu1 %v2314_v38  ;;  %v496_v26 = vand.u32 4294901760, %v495_v59  ;;  %v4492_v23 = vand.u32 4294901760, %v3241_v56  ;;  %v2124_v48 = vpack.c.bf16 %v501_v60, %v491_v24 }
  0xbd   : > { %v1217_v36 = vsub.f32 %v3209_v32, %v4697_v21  ;;  %v506_v63 = vand.u32 4294901760, %v505_v61  ;;  %v4491_v25 = vand.u32 4294901760, %v3243_v54  ;;  %v4490_v28 = vand.u32 4294901760, %v3248_v47 }
  0xbe   : > { %v1208_v46 = vand.u32 4294901760, %v1207_v30  ;;  %v2316_v27 = vpack.c.bf16 %v1213_v62, %v1203_v35  ;;  %v510_v49 = vsub.f32 %v3241_v56, %v4492_v23  ;;  %v4489_v39 = vand.u32 4294901760, %v3250_v1  ;;  %2125 = vmatprep.subr.bf16.mxu0 %v2124_v48 }
  0xbf   : > { %v1218_v34 = vand.u32 4294901760, %v1217_v36  ;;  %v2126_v38 = vpack.c.bf16 %v506_v63, %v496_v26  ;;  %v520_v20 = vsub.f32 %v3243_v54, %v4491_v25  ;;  %v1222_v24 = vsub.f32 %v3248_v47, %v4490_v28 }
  0xc0   : > { %v4698_v61 = vand.u32 4294901760, %v3271_v14  ;;  %2317 = vmatprep.subr.bf16.mxu1 %v2316_v27  ;;  %v511_v60 = vand.u32 4294901760, %v510_v49  ;;  %v1232_v48 = vsub.f32 %v3250_v1, %v4489_v39  ;;  %v4700_v35 = vand.u32 4294901760, %v3279_v37 }
  0xc1   : > { %v2318_v59 = vpack.c.bf16 %v1218_v34, %v1208_v46  ;;  %2127 = vmatpush1.bf16.msra.mxu0 %v2126_v38  ;;  %v4699_v34 = vand.u32 4294901760, %v3273_v42  ;;  %v521_v21 = vand.u32 4294901760, %v520_v20  ;;  %v1223_v36 = vand.u32 4294901760, %v1222_v24  ;;  %v4704_v24 = vld [vmem:[#allocation45_spill] sm:$0xff] }
  0xc2   : > { %v515_v30 = vsub.f32 %v3271_v14, %v4698_v61  ;;  %v1227_v26 = vsub.f32 %v3279_v37, %v4700_v35  ;;  %v4701_v63 = vand.u32 4294901760, %v3281_v31  ;;  %v1233_v38 = vand.u32 4294901760, %v1232_v48 }
  0xc3   : > { %v525_v46 = vsub.f32 %v3273_v42, %v4699_v34  ;;  %2319 = vmatpush1.bf16.msra.mxu1 %v2318_v59  ;;  %v4498_v39 = vand.u32 4294901760, %v3313_v33  ;;  %v2128_v28 = vpack.c.bf16 %v521_v21, %v511_v60  ;;  %v4702_v34 = vld [vmem:[#allocation43_spill] sm:$0xff]  ;;  %v4496_v42 = vand.u32 4294901760, %v4703_v11 }
  0xc4   : > { %v516_v62 = vand.u32 4294901760, %v515_v30  ;;  %v1237_v27 = vsub.f32 %v3281_v31, %v4701_v63  ;;  %v1228_v61 = vand.u32 4294901760, %v1227_v26  ;;  %v4497_v23 = vand.u32 4294901760, %v4702_v34  ;;  %v4707_v63 = vld [vmem:[#allocation50_spill] sm:$0xff] }
  0xc5   : > { %v526_v49 = vand.u32 4294901760, %v525_v46  ;;  %v2320_v35 = vpack.c.bf16 %v1233_v38, %v1223_v36  ;;  %v530_v20 = vsub.f32 %v3313_v33, %v4498_v39  ;;  %v4499_v30 = vand.u32 4294901760, %v4704_v24  ;;  %2129 = vmatprep.subr.bf16.mxu0 %v2128_v28 }
  0xc6   : > { %v1238_v25 = vand.u32 4294901760, %v1237_v27  ;;  %v540_v46 = vsub.f32 %v4702_v34, %v4497_v23  ;;  %v1242_v60 = vsub.f32 %v4703_v11, %v4496_v42  ;;  %v4705_v26 = vand.u32 4294901760, %v3343_v17  ;;  %v4712_v11 = vld [vmem:[#allocation55_spill] sm:$0xff] }
  0xc7   : > { %v2130_v59 = vpack.c.bf16 %v526_v49, %v516_v62  ;;  %2321 = vmatprep.subr.bf16.mxu1 %v2320_v35  ;;  %v531_v36 = vand.u32 4294901760, %v530_v20  ;;  %v1252_v28 = vsub.f32 %v4704_v24, %v4499_v30  ;;  %v4708_v27 = vand.u32 4294901760, %v4707_v63 }
  0xc8   : > { %v2322_v48 = vpack.c.bf16 %v1238_v25, %v1228_v61  ;;  %v535_v21 = vsub.f32 %v3343_v17, %v4705_v26  ;;  %v4706_v25 = vand.u32 4294901760, %v3345_v45  ;;  %v541_v49 = vand.u32 4294901760, %v540_v46  ;;  %v4709_v26 = vld [vmem:[#allocation51_spill] sm:$0xff] }
  0xc9   : > { %2131 = vmatpush1.bf16.msra.mxu0 %v2130_v59  ;;  %v1247_v38 = vsub.f32 %v4707_v63, %v4708_v27  ;;  %v1243_v61 = vand.u32 4294901760, %v1242_v60  ;;  %v4710_v35 = vand.u32 4294901760, %v4709_v26  ;;  %v1253_v20 = vand.u32 4294901760, %v1252_v28  ;;  %v4713_v60 = vld [vmem:[#allocation56_spill] sm:$0xff] }
  0xca   : > { %v545_v62 = vsub.f32 %v3345_v45, %v4706_v25  ;;  %2323 = vmatpush1.bf16.msra.mxu1 %v2322_v48  ;;  %v536_v42 = vand.u32 4294901760, %v535_v21  ;;  %v4510_v30 = vand.u32 4294901760, %v3385_v5  ;;  %v2132_v17 = vpack.c.bf16 %v541_v49, %v531_v36  ;;  %v4711_v25 = vld [vmem:[#allocation54_spill] sm:$0xff] }
  0xcb   : > { %v1257_v59 = vsub.f32 %v4709_v26, %v4710_v35  ;;  %v1248_v39 = vand.u32 4294901760, %v1247_v38  ;;  %v4508_v45 = vand.u32 4294901760, %v4711_v25  ;;  %v4507_v34 = vand.u32 4294901760, %v4712_v11 }
  0xcc   : > { %v546_v23 = vand.u32 4294901760, %v545_v62  ;;  %v2324_v27 = vpack.c.bf16 %v1253_v20, %v1243_v61  ;;  %v550_v46 = vsub.f32 %v3385_v5, %v4510_v30  ;;  %v4509_v21 = vand.u32 4294901760, %v4713_v60  ;;  %2133 = vmatprep.subr.bf16.mxu0 %v2132_v17 }
  0xcd   : > { %v1258_v24 = vand.u32 4294901760, %v1257_v59  ;;  %v560_v62 = vsub.f32 %v4711_v25, %v4508_v45  ;;  %v1262_v36 = vsub.f32 %v4712_v11, %v4507_v34  ;;  %v4714_v38 = vand.u32 4294901760, %v3415_v19  ;;  %v4721_v25 = vld [vmem:[#allocation66_spill] sm:$0xff] }
  0xce   : > { %v2134_v48 = vpack.c.bf16 %v546_v23, %v536_v42  ;;  %2325 = vmatprep.subr.bf16.mxu1 %v2324_v27  ;;  %v551_v23 = vand.u32 4294901760, %v550_v46  ;;  %v1272_v17 = vsub.f32 %v4713_v60, %v4509_v21  ;;  %v4716_v49 = vand.u32 4294901760, %v3423_v16  ;;  %v4719_v21 = vld [vmem:[#allocation64_spill] sm:$0xff] }
  0xcf   : > { %v2326_v28 = vpack.c.bf16 %v1258_v24, %v1248_v39  ;;  %v555_v42 = vsub.f32 %v3415_v19, %v4714_v38  ;;  %v4715_v39 = vand.u32 4294901760, %v3417_v18  ;;  %v561_v35 = vand.u32 4294901760, %v560_v62  ;;  %v4717_v38 = vld [vmem:[#allocation61_spill] sm:$0xff]  ;;  %v340_v19 = vld [vmem:[#allocation5 + $0x8] sm:$0xff] }
  0xd0   : > { %2135 = vmatpush1.bf16.msra.mxu0 %v2134_v48  ;;  %v1267_v61 = vsub.f32 %v3423_v16, %v4716_v49  ;;  %v1263_v59 = vand.u32 4294901760, %v1262_v36  ;;  %v4718_v27 = vand.u32 4294901760, %v4717_v38  ;;  %v1273_v46 = vand.u32 4294901760, %v1272_v17 }
  0xd1   : > { %v565_v24 = vsub.f32 %v3417_v18, %v4715_v39  ;;  %2327 = vmatpush1.bf16.msra.mxu1 %v2326_v28  ;;  %v556_v20 = vand.u32 4294901760, %v555_v42  ;;  %v4521_v30 = vand.u32 4294901760, %v4719_v21  ;;  %v2136_v60 = vpack.c.bf16 %v561_v35, %v551_v23  ;;  %v4720_v18 = vld [vmem:[#allocation65_spill] sm:$0xff]  ;;  %v4722_v42 = vld [vmem:[#allocation67_spill] sm:$0xff] }
  0xd2   : > { %v1277_v48 = vsub.f32 %v4717_v38, %v4718_v27  ;;  %v1268_v45 = vand.u32 4294901760, %v1267_v61  ;;  %v4519_v11 = vand.u32 4294901760, %v4720_v18  ;;  %v4518_v49 = vand.u32 4294901760, %v4721_v25 }
  0xd3   : > { %v566_v34 = vand.u32 4294901760, %v565_v24  ;;  %v2328_v28 = vpack.c.bf16 %v1273_v46, %v1263_v59  ;;  %v570_v36 = vsub.f32 %v4719_v21, %v4521_v30  ;;  %v4520_v27 = vand.u32 4294901760, %v4722_v42  ;;  %2137 = vmatprep.subr.bf16.mxu0 %v2136_v60  ;;  %v4725_v59 = vld [vmem:[#allocation70_spill] sm:$0xff] }
  0xd4   : > { %v1278_v39 = vand.u32 4294901760, %v1277_v48  ;;  %v580_v24 = vsub.f32 %v4720_v18, %v4519_v11  ;;  %v1282_v23 = vsub.f32 %v4721_v25, %v4518_v49  ;;  %v3722_v61 = vand.u32 4294901760, %v340_v19 }
  0xd5   : > { %v2138_v62 = vpack.c.bf16 %v566_v34, %v556_v20  ;;  %2329 = vmatprep.subr.bf16.mxu1 %v2328_v28  ;;  %v571_v34 = vand.u32 4294901760, %v570_v36  ;;  %v1292_v35 = vsub.f32 %v4722_v42, %v4520_v27  ;;  %v4724_v60 = vand.u32 4294901760, %v3487_v22  ;;  %v4728_v28 = vld [vmem:[#allocation72_spill] sm:$0xff]  ;;  %v4730_v42 = vld [vmem:[#allocation73_spill] sm:$0xff] }
  0xd6   : > { %v2330_v17 = vpack.c.bf16 %v1278_v39, %v1268_v45  ;;  %4723 = vst [vmem:[#allocation50_spill] sm:$0xff] %v3722_v61  ;;  %v4726_v20 = vand.u32 4294901760, %v4725_v59  ;;  %v581_v46 = vand.u32 4294901760, %v580_v24  ;;  %v1283_v39 = vand.u32 4294901760, %v1282_v23  ;;  %v4733_v24 = vld [vmem:[#allocation13_spill] sm:$0xff]  ;;  %v4734_v23 = vld [vmem:[#allocation14_spill] sm:$0xff] }
  0xd7   : > { %2139 = vmatpush1.bf16.msra.mxu0 %v2138_v62  ;;  %v575_v45 = vsub.f32 %v3487_v22, %v4724_v60  ;;  %v3734_v49 = vsub.f32 %v340_v19, %v3722_v61  ;;  %v4729_v62 = vand.u32 4294901760, %v4728_v28  ;;  %v1293_v11 = vand.u32 4294901760, %v1292_v35 }
  0xd8   : > { %v585_v48 = vsub.f32 %v4725_v59, %v4726_v20  ;;  %2331 = vmatpush1.bf16.msra.mxu1 %v2330_v17  ;;  %v4731_v25 = vand.u32 4294901760, %v4730_v42  ;;  %v2140_v22 = vpack.c.bf16 %v581_v46, %v571_v34  ;;  %v2144_v19 = vpack.c.bf16 %v4734_v23, %v4733_v24  ;;  %v4736_v34 = vld [vmem:[#allocation17_spill] sm:$0xff] }
  0xd9   : > { %4727 = vst [vmem:[#allocation51_spill] sm:$0xff] %v3734_v49  ;;  %v1287_v36 = vsub.f32 %v4728_v28, %v4729_v62  ;;  %v576_v27 = vand.u32 4294901760, %v575_v45  ;;  %v3743_v20 = vand.u32 4294901760, %v3734_v49  ;;  %v2332_v59 = vpack.c.bf16 %v1293_v11, %v1283_v39  ;;  %v4737_v11 = vld [vmem:[#allocation19_spill] sm:$0xff] }
  0xda   : > { %v586_v30 = vand.u32 4294901760, %v585_v48  ;;  %v1297_v60 = vsub.f32 %v4730_v42, %v4731_v25  ;;  %2141 = vmatprep.subr.bf16.mxu0 %v2140_v22  ;;  %v4735_v25 = vld [vmem:[#allocation16_spill] sm:$0xff]  ;;  %v4740_v39 = vld [vmem:[#allocation23_spill] sm:$0xff]  ;;  %v2150_v62 = vpack.c.bf16 %v3057_v41, %v3055_v8 }
  0xdb   : > { %4732 = vst [vmem:[#allocation61_spill] sm:$0xff] %v3743_v20  ;;  %v1288_v17 = vand.u32 4294901760, %v1287_v36  ;;  %v420_v35 = vsub.f32 %v3734_v49, %v3743_v20  ;;  %2333 = vmatprep.subr.bf16.mxu1 %v2332_v59  ;;  %v2336_v46 = vpack.c.bf16 %v4736_v34, %v4735_v25  ;;  %v4738_v22 = vld [vmem:[#allocation20_spill] sm:$0xff]  ;;  %v2342_v36 = vpack.c.bf16 %v3065_v44, %v3063_v43 }
  0xdc   : > { %v2142_v18 = vpack.c.bf16 %v586_v30, %v576_v27  ;;  %v1298_v21 = vand.u32 4294901760, %v1297_v60  ;;  %v2146_v30 = vpack.c.bf16 %v4738_v22, %v4737_v11  ;;  %v4739_v27 = vld [vmem:[#allocation22_spill] sm:$0xff]  ;;  %v2152_v60 = vpack.c.bf16 %v3099_v50, %v3097_v51 }
  0xdd   : > { %v421_v48 = vand.u32 4294901760, %v420_v35  ;;  %v2338_v59 = vpack.c.bf16 %v4740_v39, %v4739_v27  ;;  %v2346_v35 = vpack.c.bf16 %v3137_v7, %v3135_v15  ;;  %v2158_v20 = vpack.c.bf16 %v3201_v29, %v3199_v12 }
  0xde   : > { %2143 = vmatpush1.bf16.msra.mxu0 %v2142_v18  ;;  %v2334_v45 = vpack.c.bf16 %v1298_v21, %v1288_v17  ;;  %v2148_v18 = vpack.c.bf16 %v3026_v2, %v3024_v0  ;;  %v2340_v21 = vpack.c.bf16 %v3030_v4, %v3028_v3  ;;  %v2344_v17 = vpack.c.bf16 %v3106_v57, %v3104_v58 }
  0xdf   : > { %2145 = vmatprep.subr.bf16.mxu0 %v2144_v19  ;;  %422 = vmatmul.mubr.f32.gmra.mrb[2].mxu0 %v421_v48  ;;  %v2154_v19 = vpack.c.bf16 %v3129_v55, %v3127_v10  ;;  %v2350_v39 = vpack.c.bf16 %v3209_v32, %v3207_v9  ;;  %v4742_v27 = vand.u32 4294901760, %v4733_v24  ;;  %v4743_v22 = vand.u32 4294901760, %v4734_v23 }
  0xe0   : > { %2335 = vmatpush1.bf16.msra.mxu1 %v2334_v45  ;;  %620 = vmatprep.mubr.f32.mxu0 %v4611_v13  ;;  %v4741_v45 = vld [vmem:[#allocation11_spill] sm:$0xff]  ;;  %v4745_v49 = vand.u32 4294901760, %v4736_v34  ;;  %v4746_v24 = vand.u32 4294901760, %v3024_v0  ;;  %v4747_v23 = vand.u32 4294901760, %v3026_v2  ;;  %v4752_v0 = vand.u32 4294901760, %v3063_v43 }
  0xe1   : > { %1134 = vmatmul.mubr.f32.gmra.mrb[2].mxu1 %v421_v48  ;;  %2337 = vmatprep.subr.bf16.mxu1 %v2336_v46  ;;  %v2156_v48 = vpack.c.bf16 %v3171_v40, %v3169_v53  ;;  %v2348_v46 = vpack.c.bf16 %v3178_v6, %v3176_v52  ;;  %v3787_v11 = vpack.c.bf16 %v4743_v22, %v4742_v27  ;;  %v4750_v27 = vand.u32 4294901760, %v3055_v8 }
  0xe2   : > { %1332 = vmatprep.mubr.f32.mxu1 %v4611_v13  ;;  %v3803_v22 = vpack.c.bf16 %v4747_v23, %v4746_v24  ;;  %v4753_v2 = vand.u32 4294901760, %v3065_v44  ;;  %v4756_v8 = vand.u32 4294901760, %v3104_v58  ;;  %v4758_v43 = vand.u32 4294901760, %v3127_v10 }
  0xe3   : > { %622 = vmatmul.mubr.f32.vlgmr.msra.gmra.mrb[0].mxu0 %v4741_v45  ;;  %v4759_v44 = vand.u32 4294901760, %v3129_v55  ;;  %v4762_v58 = vand.u32 4294901760, %v3169_v53  ;;  %v4764_v10 = vand.u32 4294901760, %v3176_v52  ;;  %v4765_v55 = vand.u32 4294901760, %v3178_v6 }
  0xe4   : > { %2147 = vmatpush1.bf16.msra.mxu0 %v2146_v30  ;;  %v2160_v30 = vpack.c.bf16 %v3243_v54, %v3241_v56  ;;  %627 = vmatprep.mubr.f32.mxu0 %v4611_v13  ;;  %v4768_v53 = vand.u32 4294901760, %v3207_v9  ;;  %v4770_v52 = vand.u32 4294901760, %v3241_v56  ;;  %v4771_v6 = vand.u32 4294901760, %v3243_v54  ;;  %v4775_v9 = vld [vmem:[#allocation39_spill] sm:$0xff] }
  0xe5   : > { %1334 = vmatmul.mubr.f32.vlgmr.msra.gmra.mrb[0].mxu1 %v4741_v45  ;;  %v4744_v45 = vand.u32 4294901760, %v4735_v25  ;;  %2149 = vmatprep.subr.bf16.mxu0 %v2148_v18  ;;  %v4749_v25 = vand.u32 4294901760, %v3030_v4  ;;  %v4751_v18 = vand.u32 4294901760, %v3057_v41  ;;  %v4755_v4 = vand.u32 4294901760, %v3099_v50 }
  0xe6   : > { %2339 = vmatpush1.bf16.msra.mxu1 %v2338_v59  ;;  %v2352_v59 = vpack.c.bf16 %v3250_v1, %v3248_v47  ;;  %1339 = vmatprep.mubr.f32.mxu1 %v4611_v13  ;;  %v4757_v41 = vand.u32 4294901760, %v3106_v57  ;;  %v4761_v50 = vand.u32 4294901760, %v3137_v7  ;;  %v4763_v57 = vand.u32 4294901760, %v3171_v40 }
  0xe7   : > { %v3793_v42 = vpack.c.bf16 %v4745_v49, %v4744_v45  ;;  %2341 = vmatprep.subr.bf16.mxu1 %v2340_v21  ;;  %v4748_v49 = vand.u32 4294901760, %v3028_v3  ;;  %v3817_v21 = vpack.c.bf16 %v4751_v18, %v4750_v27  ;;  %v3823_v45 = vpack.c.bf16 %v4753_v2, %v4752_v0  ;;  %629 = vmatmul.mubr.f32.gmra.mrb[2].mxu0 %v3722_v61 }
  0xe8   : > { %v4754_v3 = vand.u32 4294901760, %v3097_v51  ;;  %v3837_v23 = vpack.c.bf16 %v4757_v41, %v4756_v8  ;;  %2151 = vmatpush1.bf16.msra.mxu0 %v2150_v62  ;;  %v4760_v51 = vand.u32 4294901760, %v3135_v15  ;;  %v3855_v27 = vpack.c.bf16 %v4763_v57, %v4762_v58  ;;  %731 = vmatprep.mubr.f32.mxu0 %v4611_v13  ;;  %v4780_v8 = vld [vmem:[#allocation43_spill] sm:$0xff] }
  0xe9   : > { %v3811_v34 = vpack.c.bf16 %v4749_v25, %v4748_v49  ;;  %1341 = vmatmul.mubr.f32.gmra.mrb[2].mxu1 %v3722_v61  ;;  %v3843_v49 = vpack.c.bf16 %v4759_v44, %v4758_v43  ;;  %v3861_v18 = vpack.c.bf16 %v4765_v55, %v4764_v10  ;;  %2153 = vmatprep.subr.bf16.mxu0 %v2152_v60  ;;  %v4766_v15 = vand.u32 4294901760, %v3199_v12  ;;  %v4784_v44 = vld [vmem:[#allocation45_spill] sm:$0xff]  ;;  %v4787_v58 = vld [vmem:[#allocation47_spill] sm:$0xff]  ;;  %v4789_v10 = vld [vmem:[#allocation48_spill] sm:$0xff] }
  0xea   : > { %v3831_v24 = vpack.c.bf16 %v4755_v4, %v4754_v3  ;;  %2343 = vmatpush1.bf16.msra.mxu1 %v2342_v36  ;;  %v3849_v25 = vpack.c.bf16 %v4761_v50, %v4760_v51  ;;  %v4767_v7 = vand.u32 4294901760, %v3201_v29  ;;  %v4769_v40 = vand.u32 4294901760, %v3209_v32  ;;  %1443 = vmatprep.mubr.f32.mxu1 %v4611_v13 }
  0xeb   : > { %2345 = vmatprep.subr.bf16.mxu1 %v2344_v17  ;;  %v3879_v0 = vpack.c.bf16 %v4771_v6, %v4770_v52  ;;  %v4772_v29 = vand.u32 4294901760, %v3248_v47  ;;  %v4773_v12 = vand.u32 4294901760, %v3250_v1  ;;  %v4774_v32 = vand.u32 4294901760, %v3271_v14  ;;  %v4782_v1 = vld [vmem:[#allocation44_spill] sm:$0xff]  ;;  %v4796_v6 = vld [vmem:[#allocation54_spill] sm:$0xff] }
  0xec   : > { %v3867_v62 = vpack.c.bf16 %v4767_v7, %v4766_v15  ;;  %v3873_v36 = vpack.c.bf16 %v4769_v40, %v4768_v53  ;;  %v4776_v17 = vand.u32 4294901760, %v4775_v9  ;;  %v4777_v54 = vand.u32 4294901760, %v3279_v37  ;;  %2155 = vmatpush1.bf16.msra.mxu0 %v2154_v19 }
  0xed   : > { %v3887_v60 = vpack.c.bf16 %v4773_v12, %v4772_v29  ;;  %v4778_v56 = vand.u32 4294901760, %v3281_v31  ;;  %v4779_v4 = vand.u32 4294901760, %v3313_v33  ;;  %v4781_v47 = vand.u32 4294901760, %v4780_v8  ;;  %2157 = vmatprep.subr.bf16.mxu0 %v2156_v48  ;;  %v4820_v48 = vld [vmem:[#allocation69_spill] sm:$0xff] }
  0xee   : > { %v3893_v2 = vpack.c.bf16 %v4776_v17, %v4774_v32  ;;  %v4783_v43 = vand.u32 4294901760, %v4782_v1  ;;  %v4785_v51 = vand.u32 4294901760, %v4784_v44  ;;  %v4788_v57 = vand.u32 4294901760, %v4787_v58  ;;  %2347 = vmatpush1.bf16.msra.mxu1 %v2346_v35  ;;  %v4799_v32 = vld [vmem:[#allocation55_spill] sm:$0xff] }
  0xef   : > { %v3899_v3 = vpack.c.bf16 %v4778_v56, %v4777_v54  ;;  %v3905_v41 = vpack.c.bf16 %v4781_v47, %v4779_v4  ;;  %v4790_v55 = vand.u32 4294901760, %v4789_v10  ;;  %v4792_v7 = vand.u32 4294901760, %v4707_v63  ;;  %v4801_v54 = vld [vmem:[#allocation56_spill] sm:$0xff]  ;;  %v4804_v47 = vld [vmem:[#allocation58_spill] sm:$0xff]  ;;  %2349 = vmatprep.subr.bf16.mxu1 %v2348_v46 }
  0xf0   : > { %v3911_v50 = vpack.c.bf16 %v4785_v51, %v4783_v43  ;;  %v4793_v53 = vand.u32 4294901760, %v4709_v26  ;;  %v4795_v52 = vand.u32 4294901760, %v3385_v5  ;;  %v4797_v29 = vand.u32 4294901760, %v4796_v6  ;;  %v4806_v51 = vld [vmem:[#allocation59_spill] sm:$0xff]  ;;  %2159 = vmatpush1.bf16.msra.mxu0 %v2158_v20 }
  0xf1   : > { %v3917_v15 = vpack.c.bf16 %v4790_v55, %v4788_v57  ;;  %v4800_v17 = vand.u32 4294901760, %v4799_v32  ;;  %v4802_v56 = vand.u32 4294901760, %v4801_v54  ;;  %v4805_v43 = vand.u32 4294901760, %v4804_v47  ;;  %2161 = vmatprep.subr.bf16.mxu0 %v2160_v30 }
  0xf2   : > { %4786 = vst [vmem:[#allocation72_spill] sm:$0xff] %v3911_v50  ;;  %v3923_v40 = vpack.c.bf16 %v4793_v53, %v4792_v7  ;;  %v3929_v12 = vpack.c.bf16 %v4797_v29, %v4795_v52  ;;  %v4807_v57 = vand.u32 4294901760, %v4806_v51  ;;  %v4809_v19 = vand.u32 4294901760, %v3423_v16  ;;  %v4812_v53 = vld [vmem:[#allocation64_spill] sm:$0xff]  ;;  %v4814_v29 = vld [vmem:[#allocation65_spill] sm:$0xff]  ;;  %2351 = vmatpush1.bf16.msra.mxu1 %v2350_v39 }
  0xf3   : > { %4791 = vst [vmem:[#allocation13_spill] sm:$0xff] %v3917_v15  ;;  %v3935_v4 = vpack.c.bf16 %v4802_v56, %v4800_v17  ;;  %v4810_v35 = vand.u32 4294901760, %v4717_v38  ;;  %v4813_v52 = vand.u32 4294901760, %v4812_v53  ;;  %v4815_v61 = vand.u32 4294901760, %v4814_v29  ;;  %v4816_v56 = vld [vmem:[#allocation66_spill] sm:$0xff]  ;;  %2353 = vmatprep.subr.bf16.mxu1 %v2352_v59 }
  0xf4   : > { %4794 = vst [vmem:[#allocation14_spill] sm:$0xff] %v3923_v40  ;;  %4798 = vst [vmem:[#allocation16_spill] sm:$0xff] %v3929_v12  ;;  %v3941_v55 = vpack.c.bf16 %v4807_v57, %v4805_v43  ;;  %v4818_v12 = vld [vmem:[#allocation67_spill] sm:$0xff]  ;;  %v4821_v46 = vand.u32 4294901760, %v4820_v48  ;;  %v4822_v57 = vld [vmem:[#allocation70_spill] sm:$0xff]  ;;  %v2166_v20 = vpack.c.bf16 %v4789_v10, %v4787_v58  ;;  %v2358_v39 = vpack.c.bf16 %v4709_v26, %v4707_v63 }
  0xf5   : > { %4803 = vst [vmem:[#allocation17_spill] sm:$0xff] %v3935_v4  ;;  %v3947_v7 = vpack.c.bf16 %v4810_v35, %v4809_v19  ;;  %v3953_v17 = vpack.c.bf16 %v4815_v61, %v4813_v52  ;;  %v4817_v4 = vand.u32 4294901760, %v4816_v56  ;;  %v4819_v40 = vand.u32 4294901760, %v4818_v12  ;;  %v4825_v35 = vld [vmem:[#allocation73_spill] sm:$0xff]  ;;  %v4835_v58 = vld [vmem:[#allocation51_spill] sm:$0xff] }
  0xf6   : > { %4808 = vst [vmem:[#allocation39_spill] sm:$0xff] %v3941_v55  ;;  %v4823_v55 = vand.u32 4294901760, %v4822_v57  ;;  %v4824_v19 = vand.u32 4294901760, %v4728_v28  ;;  %v2162_v61 = vpack.c.bf16 %v4775_v9, %v3271_v14  ;;  %v2170_v14 = vpack.c.bf16 %v4806_v51, %v4804_v47  ;;  %v4830_v9 = vld [vmem:[#allocation74_spill] sm:$0xff]  ;;  %v4842_v47 = vld [vmem:[#allocation31_spill] sm:$0xff]  ;;  %v4844_v51 = vld [vmem:[#allocation32_spill] sm:$0xff] }
  0xf7   : > { %4811 = vst [vmem:[#allocation43_spill] sm:$0xff] %v3947_v7  ;;  %v3959_v43 = vpack.c.bf16 %v4819_v40, %v4817_v4  ;;  %v4826_v7 = vand.u32 4294901760, %v4825_v35  ;;  %v2354_v40 = vpack.c.bf16 %v3281_v31, %v3279_v37  ;;  %v2164_v4 = vpack.c.bf16 %v4780_v8, %v3313_v33  ;;  %v4850_v52 = vld [vmem:[#allocation35_spill] sm:$0xff] }
  0xf8   : > { %v3965_v15 = vpack.c.bf16 %v4823_v55, %v4821_v46  ;;  %v2356_v55 = vpack.c.bf16 %v4784_v44, %v4782_v1  ;;  %2163 = vmatpush1.bf16.msra.mxu0 %v2162_v61  ;;  %v2168_v31 = vpack.c.bf16 %v4796_v6, %v3385_v5  ;;  %v2360_v37 = vpack.c.bf16 %v4801_v54, %v4799_v32  ;;  %v4839_v32 = vld [vmem:[#allocation29_spill] sm:$0xff]  ;;  %v4840_v54 = vld [vmem:[#allocation30_spill] sm:$0xff]  ;;  %v4858_v46 = vld [vmem:[#allocation40_spill] sm:$0xff] }
  0xf9   : > { %v3971_v50 = vpack.c.bf16 %v4826_v7, %v4824_v19  ;;  %2355 = vmatpush1.bf16.msra.mxu1 %v2354_v40  ;;  %2165 = vmatprep.subr.bf16.mxu0 %v2164_v4  ;;  %v2362_v33 = vpack.c.bf16 %v4717_v38, %v3423_v16  ;;  %v2172_v63 = vpack.c.bf16 %v4814_v29, %v4812_v53  ;;  %v4827_v16 = vmov 1.0|1.0   ;;  %v4846_v7 = vld [vmem:[#allocation33_spill] sm:$0xff]  ;;  %v4848_v53 = vld [vmem:[#allocation34_spill] sm:$0xff]  ;;  %v4852_v29 = vld [vmem:[#allocation36_spill] sm:$0xff] }
  0xfa   : > { %2357 = vmatprep.subr.bf16.mxu1 %v2356_v55  ;;  %v2364_v26 = vpack.c.bf16 %v4818_v12, %v4816_v56  ;;  %v2174_v5 = vpack.c.bf16 %v4822_v57, %v4820_v48  ;;  %v2366_v30 = vpack.c.bf16 %v4825_v35, %v4728_v28  ;;  %v4838_v12 = vld [vmem:[#allocation28_spill] sm:$0xff]  ;;  %vm4841_vm6 = vnez %v4840_v54  ;;  %v4854_v56 = vld [vmem:[#allocation37_spill] sm:$0xff]  ;;  %v4856_v48 = vld [vmem:[#allocation38_spill] sm:$0xff] }
  0xfb   : > { %vm4843_vm7 = vnez %v4842_v47  ;;  %vm4845_vm12 = vnez %v4844_v51  ;;  %vm4847_vm13 = vnez %v4846_v7  ;;  %v4860_v57 = vld [vmem:[#allocation41_spill] sm:$0xff]  ;;  %v4862_v19 = vld [vmem:[#allocation42_spill] sm:$0xff]  ;;  %v4868_v40 = vld [vmem:[#allocation52_spill] sm:$0xff] }
  0xfc   : > { %2167 = vmatpush1.bf16.msra.mxu0 %v2166_v20  ;;  %v4864_v35 = vld [vmem:[#allocation46_spill] sm:$0xff]  ;;  %v4866_v61 = vld [vmem:[#allocation49_spill] sm:$0xff]  ;;  %v4874_v20 = vld [vmem:[#allocation60_spill] sm:$0xff] }
  0xfd   : > { %2359 = vmatpush1.bf16.msra.mxu1 %v2358_v39  ;;  %2169 = vmatprep.subr.bf16.mxu0 %v2168_v31  ;;  %v4870_v4 = vld [vmem:[#allocation53_spill] sm:$0xff]  ;;  %v4876_v39 = vld [vmem:[#allocation62_spill] sm:$0xff]  ;;  %v4878_v31 = vld [vmem:[#allocation63_spill] sm:$0xff] }
  0xfe   : > { %2361 = vmatprep.subr.bf16.mxu1 %v2360_v37  ;;  %v4872_v55 = vld [vmem:[#allocation57_spill] sm:$0xff]  ;;  %v4890_v37 = vld [vmem:[#allocation75_spill] sm:$0xff] }
 0x100   : > { %2171 = vmatpush1.bf16.msra.mxu0 %v2170_v14 }
 0x101   : > { %2363 = vmatpush1.bf16.msra.mxu1 %v2362_v33  ;;  %2173 = vmatprep.subr.bf16.mxu0 %v2172_v63  ;;  %v4882_v33 = vld [vmem:[#allocation19_spill] sm:$0xff] }
 0x102   : > { %2365 = vmatprep.subr.bf16.mxu1 %v2364_v26  ;;  %v4883_v63 = vand.u32 4294901760, %v4882_v33  ;;  %v4884_v26 = vld [vmem:[#allocation20_spill] sm:$0xff] }
 0x104   : > { %2175 = vmatpush1.bf16.msra.mxu0 %v2174_v5  ;;  %v4885_v5 = vand.u32 4294901760, %v4884_v26 }
 0x105   : > { %2367 = vmatpush1.bf16.msra.mxu1 %v2366_v30  ;;  %2177 = vmatprep.subr.msk.bf16.mxu0 %vm2920_vm4, %v4827_v16 }
 0x106   : > { %2369 = vmatprep.subr.msk.bf16.mxu1 %vm2933_vm5, %v4827_v16  ;;  %v2210_v30 = vpack.c.bf16 %v4885_v5, %v4883_v63 }
 0x107   : > { %734 = vmatmul.mubr.f32.vlgmr.msra.gmra.mrb[0].mxu0 %v4830_v9 }
 0x108   : > { %1446 = vmatmul.mubr.f32.vlgmr.msra.gmra.mrb[0].mxu1 %v4830_v9  ;;  %2179 = vmatpush1.bf16.msk.msra.mxu0 %vm2950_vm10, %v4827_v16  ;;  %v4886_v9 = vld [vmem:[#allocation22_spill] sm:$0xff] }
 0x109   : > { %2371 = vmatpush1.bf16.msk.msra.mxu1 %vm2963_vm11, %v4827_v16  ;;  %2181 = vmatprep.subr.msk.bf16.mxu0 %vm2986_vm0, %v4827_v16 }
 0x10a   : > { %2373 = vmatprep.subr.msk.bf16.mxu1 %vm2997_vm1, %v4827_v16  ;;  %739 = vmatprep.mubr.f32.mxu0 %v4611_v13 }
 0x10b   : > { %1451 = vmatprep.mubr.f32.mxu1 %v4611_v13  ;;  %742 = vmatmul.mubr.f32.gmra.mrb[2].mxu0 %v4835_v58 }
 0x10c   : > { %1454 = vmatmul.mubr.f32.gmra.mrb[2].mxu1 %v4835_v58  ;;  %2183 = vmatpush1.bf16.msk.msra.mxu0 %vm3046_vm8, %v4827_v16  ;;  %v4887_v58 = vand.u32 4294901760, %v4886_v9 }
 0x10d   : > { %2375 = vmatpush1.bf16.msk.msra.mxu1 %vm3059_vm9, %v4827_v16  ;;  %2185 = vmatprep.subr.msk.bf16.mxu0 %vm3082_vm2, %v4827_v16  ;;  %vm4851_vm2 = vnez %v4850_v52 }
 0x10e   : > { %2377 = vmatprep.subr.msk.bf16.mxu1 %vm3093_vm3, %v4827_v16  ;;  %812 = vmatprep.mubr.f32.mxu0 %v4611_v13  ;;  %vm4849_vm3 = vnez %v4848_v53 }
 0x10f   : > { %1524 = vmatprep.mubr.f32.mxu1 %v4611_v13 }
 0x110   : > { %2187 = vmatpush1.bf16.msk.msra.mxu0 %vm4841_vm6, %v4827_v16  ;;  %vm4853_vm6 = vnez %v4852_v29 }
 0x111   : > { %2379 = vmatpush1.bf16.msk.msra.mxu1 %vm4843_vm7, %v4827_v16  ;;  %2189 = vmatprep.subr.msk.bf16.mxu0 %vm4845_vm12, %v4827_v16  ;;  %vm4855_vm7 = vnez %v4854_v56  ;;  %vm4857_vm12 = vnez %v4856_v48 }
 0x112   : > { %2381 = vmatprep.subr.msk.bf16.mxu1 %vm4847_vm13, %v4827_v16  ;;  %vm4859_vm13 = vnez %v4858_v46 }
 0x114   : > { %2191 = vmatpush1.bf16.msk.msra.mxu0 %vm4849_vm3, %v4827_v16  ;;  %vm4861_vm3 = vnez %v4860_v57 }
 0x115   : > { %2383 = vmatpush1.bf16.msk.msra.mxu1 %vm4851_vm2, %v4827_v16  ;;  %2193 = vmatprep.subr.msk.bf16.mxu0 %vm4853_vm6, %v4827_v16  ;;  %vm4863_vm2 = vnez %v4862_v19  ;;  %vm4865_vm6 = vnez %v4864_v35 }
 0x116   : > { %2385 = vmatprep.subr.msk.bf16.mxu1 %vm4855_vm7, %v4827_v16  ;;  %vm4867_vm7 = vnez %v4866_v61 }
 0x118   : > { %2195 = vmatpush1.bf16.msk.msra.mxu0 %vm4857_vm12, %v4827_v16  ;;  %vm4869_vm12 = vnez %v4868_v40 }
 0x119   : > { %2387 = vmatpush1.bf16.msk.msra.mxu1 %vm4859_vm13, %v4827_v16  ;;  %2197 = vmatprep.subr.msk.bf16.mxu0 %vm4861_vm3, %v4827_v16  ;;  %vm4871_vm13 = vnez %v4870_v4  ;;  %vm4873_vm3 = vnez %v4872_v55 }
 0x11a   : > { %2389 = vmatprep.subr.msk.bf16.mxu1 %vm4863_vm2, %v4827_v16  ;;  %vm4875_vm2 = vnez %v4874_v20 }
 0x11c   : > { %2199 = vmatpush1.bf16.msk.msra.mxu0 %vm4865_vm6, %v4827_v16  ;;  %vm4877_vm6 = vnez %v4876_v39  ;;  %v4888_v39 = vld [vmem:[#allocation23_spill] sm:$0xff] }
 0x11d   : > { %2391 = vmatpush1.bf16.msk.msra.mxu1 %vm4867_vm7, %v4827_v16  ;;  %2201 = vmatprep.subr.msk.bf16.mxu0 %vm4869_vm12, %v4827_v16  ;;  %vm4879_vm7 = vnez %v4878_v31  ;;  %v4889_v20 = vand.u32 4294901760, %v4888_v39  ;;  %v4891_v39 = vld [vmem:[#allocation61_spill] sm:$0xff] }
 0x11e   : > { %2393 = vmatprep.subr.msk.bf16.mxu1 %vm4871_vm13, %v4827_v16 }
 0x11f   : > { %v2402_v55 = vpack.c.bf16 %v4889_v20, %v4887_v58 }
 0x120   : > { %2203 = vmatpush1.bf16.msk.msra.mxu0 %vm4873_vm3, %v4827_v16 }
 0x121   : > { %2395 = vmatpush1.bf16.msk.msra.mxu1 %vm4875_vm2, %v4827_v16  ;;  %2205 = vmatprep.subr.msk.bf16.mxu0 %vm4877_vm6, %v4827_v16 }
 0x122   : > { %2397 = vmatprep.subr.msk.bf16.mxu1 %vm4879_vm7, %v4827_v16 }
 0x124   : > { %2207 = vmatpush1.bf16.msk.msra.mxu0 %vm3478_vm14, %v4827_v16 }
 0x125   : > { %2399 = vmatpush1.bf16.msk.msra.mxu1 %vm3491_vm15, %v4827_v16  ;;  %2209 = vmatprep.subr.bf16.mxu0 %v3787_v11  ;;  %v4893_v11 = vld [vmem:[#allocation13_spill] sm:$0xff] }
 0x126   : > { %2401 = vmatprep.subr.bf16.mxu1 %v3793_v42  ;;  %v4892_v42 = vld [vmem:[#allocation72_spill] sm:$0xff] }
 0x127   : > { %816 = vmatmul.mubr.f32.vlgmr.msra.gmra.mrb[0].mxu0 %v4890_v37 }
 0x128   : > { %1528 = vmatmul.mubr.f32.vlgmr.msra.gmra.mrb[0].mxu1 %v4890_v37  ;;  %2211 = vmatpush1.bf16.msra.mxu0 %v2210_v30 }
 0x129   : > { %2403 = vmatpush1.bf16.msra.mxu1 %v2402_v55  ;;  %2213 = vmatprep.subr.bf16.mxu0 %v3803_v22  ;;  %v4894_v22 = vld [vmem:[#allocation14_spill] sm:$0xff] }
 0x12a   : > { %2405 = vmatprep.subr.bf16.mxu1 %v3811_v34  ;;  %821 = vmatprep.mubr.f32.mxu0 %v4611_v13  ;;  %v4895_v34 = vld [vmem:[#allocation16_spill] sm:$0xff] }
 0x12b   : > { %1533 = vmatprep.mubr.f32.mxu1 %v4611_v13  ;;  %825 = vmatmul.mubr.f32.gmra.mrb[2].mxu0 %v4891_v39 }
 0x12c   : > { %1537 = vmatmul.mubr.f32.gmra.mrb[2].mxu1 %v4891_v39  ;;  %2215 = vmatpush1.bf16.msra.mxu0 %v3817_v21  ;;  %v4896_v21 = vld [vmem:[#allocation17_spill] sm:$0xff] }
 0x12d   : > { %2407 = vmatpush1.bf16.msra.mxu1 %v3823_v45  ;;  %2217 = vmatprep.subr.bf16.mxu0 %v3831_v24  ;;  %v4897_v45 = vld [vmem:[#allocation39_spill] sm:$0xff] }
 0x12e   : > { %2409 = vmatprep.subr.bf16.mxu1 %v3837_v23  ;;  %959 = vmatprep.mubr.f32.mxu0 %v4611_v13  ;;  %v4898_v24 = vld [vmem:[#allocation43_spill] sm:$0xff] }
 0x12f   : > { %1671 = vmatprep.mubr.f32.mxu1 %v4611_v13  ;;  %v4899_v23 = vld [vmem:[#allocation11_spill] sm:$0xff] }
 0x130   : > { %2219 = vmatpush1.bf16.msra.mxu0 %v3843_v49  ;;  %v4900_v49 = vld [vmem:[#allocation50_spill] sm:$0xff] }
 0x131   : > { %2411 = vmatpush1.bf16.msra.mxu1 %v3849_v25  ;;  %2221 = vmatprep.subr.bf16.mxu0 %v3855_v27 }
 0x132   : > { %2413 = vmatprep.subr.bf16.mxu1 %v3861_v18 }
 0x134   : > { %2223 = vmatpush1.bf16.msra.mxu0 %v3867_v62 }
 0x135   : > { %2415 = vmatpush1.bf16.msra.mxu1 %v3873_v36  ;;  %2225 = vmatprep.subr.bf16.mxu0 %v3879_v0 }
 0x136   : > { %2417 = vmatprep.subr.bf16.mxu1 %v3887_v60 }
 0x138   : > { %2227 = vmatpush1.bf16.msra.mxu0 %v3893_v2 }
 0x139   : > { %2419 = vmatpush1.bf16.msra.mxu1 %v3899_v3  ;;  %2229 = vmatprep.subr.bf16.mxu0 %v3905_v41 }
 0x13a   : > { %2421 = vmatprep.subr.bf16.mxu1 %v4892_v42 }
 0x13c   : > { %2231 = vmatpush1.bf16.msra.mxu0 %v4893_v11 }
 0x13d   : > { %2423 = vmatpush1.bf16.msra.mxu1 %v4894_v22  ;;  %2233 = vmatprep.subr.bf16.mxu0 %v4895_v34 }
 0x13e   : > { %2425 = vmatprep.subr.bf16.mxu1 %v4896_v21 }
 0x140   : > { %2235 = vmatpush1.bf16.msra.mxu0 %v4897_v45 }
 0x141   : > { %2427 = vmatpush1.bf16.msra.mxu1 %v4898_v24  ;;  %2237 = vmatprep.subr.bf16.mxu0 %v3953_v17 }
 0x142   : > { %2429 = vmatprep.subr.bf16.mxu1 %v3959_v43 }
 0x144   : > { %2239 = vmatpush1.bf16.msra.mxu0 %v3965_v15 }
 0x145   : > { %2431 = vmatpush1.bf16.msra.mxu1 %v3971_v50  ;;  %2241 = vmatprep.subr.msk.bf16.mxu0 %vm2920_vm4, %v4827_v16  ;;  %vm4901_vm4 = vnez %v4838_v12 }
 0x146   : > { %2433 = vmatprep.subr.msk.bf16.mxu1 %vm2933_vm5, %v4827_v16  ;;  %vm4902_vm5 = vnez %v4839_v32 }
 0x147   : > { %961 = vmatmul.mubr.f32.vlgmr.msra.gmra.mrb[0].mxu0 %v4899_v23 }
 0x148   : > { %1673 = vmatmul.mubr.f32.vlgmr.msra.gmra.mrb[0].mxu1 %v4899_v23  ;;  %2243 = vmatpush1.bf16.msk.msra.mxu0 %vm2950_vm10, %v4827_v16  ;;  %vm4903_vm10 = vnez %v4840_v54 }
 0x149   : > { %2435 = vmatpush1.bf16.msk.msra.mxu1 %vm2963_vm11, %v4827_v16  ;;  %2245 = vmatprep.subr.msk.bf16.mxu0 %vm2986_vm0, %v4827_v16  ;;  %vm4904_vm11 = vnez %v4842_v47  ;;  %vm4905_vm0 = vnez %v4844_v51 }
 0x14a   : > { %2437 = vmatprep.subr.msk.bf16.mxu1 %vm2997_vm1, %v4827_v16  ;;  %966 = vmatprep.mubr.f32.mxu0 %v4611_v13  ;;  %vm4906_vm1 = vnez %v4846_v7 }
 0x14b   : > { %1678 = vmatprep.mubr.f32.mxu1 %v4611_v13  ;;  %968 = vmatmul.mubr.f32.gmra.mrb[2].mxu0 %v4900_v49 }
 0x14c   : > { %1680 = vmatmul.mubr.f32.gmra.mrb[2].mxu1 %v4900_v49  ;;  %2247 = vmatpush1.bf16.msk.msra.mxu0 %vm3046_vm8, %v4827_v16  ;;  %vm4907_vm8 = vnez %v4848_v53 }
 0x14d   : > { %2439 = vmatpush1.bf16.msk.msra.mxu1 %vm3059_vm9, %v4827_v16  ;;  %2249 = vmatprep.subr.msk.bf16.mxu0 %vm4901_vm4, %v4827_v16  ;;  %vm4908_vm9 = vnez %v4850_v52  ;;  %vm4909_vm4 = vnez %v4852_v29 }
 0x14e   : > { %2441 = vmatprep.subr.msk.bf16.mxu1 %vm4902_vm5, %v4827_v16  ;;  %1038 = vmatprep.mubr.f32.mxu0 %v4611_v13  ;;  %vm4910_vm5 = vnez %v4854_v56 }
 0x14f   : > { %1750 = vmatprep.mubr.f32.mxu1 %v4611_v13 }
 0x150   : > { %2251 = vmatpush1.bf16.msk.msra.mxu0 %vm4903_vm10, %v4827_v16  ;;  %vm4911_vm10 = vnez %v4856_v48 }
 0x151   : > { %2443 = vmatpush1.bf16.msk.msra.mxu1 %vm4904_vm11, %v4827_v16  ;;  %2253 = vmatprep.subr.msk.bf16.mxu0 %vm4905_vm0, %v4827_v16  ;;  %vm4912_vm11 = vnez %v4858_v46  ;;  %vm4913_vm0 = vnez %v4860_v57 }
 0x152   : > { %2445 = vmatprep.subr.msk.bf16.mxu1 %vm4906_vm1, %v4827_v16  ;;  %vm4914_vm1 = vnez %v4862_v19 }
 0x154   : > { %2255 = vmatpush1.bf16.msk.msra.mxu0 %vm4907_vm8, %v4827_v16  ;;  %vm4915_vm8 = vnez %v4864_v35 }
 0x155   : > { %2447 = vmatpush1.bf16.msk.msra.mxu1 %vm4908_vm9, %v4827_v16  ;;  %2257 = vmatprep.subr.msk.bf16.mxu0 %vm4909_vm4, %v4827_v16  ;;  %vm4916_vm9 = vnez %v4866_v61 }
 0x156   : > { %2449 = vmatprep.subr.msk.bf16.mxu1 %vm4910_vm5, %v4827_v16 }
 0x158   : > { %2259 = vmatpush1.bf16.msk.msra.mxu0 %vm4911_vm10, %v4827_v16 }
 0x159   : > { %2451 = vmatpush1.bf16.msk.msra.mxu1 %vm4912_vm11, %v4827_v16  ;;  %2261 = vmatprep.subr.msk.bf16.mxu0 %vm4913_vm0, %v4827_v16 }
 0x15a   : > { %2453 = vmatprep.subr.msk.bf16.mxu1 %vm4914_vm1, %v4827_v16 }
 0x15c   : > { %2263 = vmatpush1.bf16.msk.msra.mxu0 %vm4915_vm8, %v4827_v16 }
 0x15d   : > { %2455 = vmatpush1.bf16.msk.msra.mxu1 %vm4916_vm9, %v4827_v16  ;;  %2265 = vmatprep.subr.msk.bf16.mxu0 %vm4869_vm12, %v4827_v16 }
 0x15e   : > { %2457 = vmatprep.subr.msk.bf16.mxu1 %vm4871_vm13, %v4827_v16 }
 0x160   : > { %2267 = vmatpush1.bf16.msk.msra.mxu0 %vm4873_vm3, %v4827_v16 }
 0x161   : > { %2459 = vmatpush1.bf16.msk.msra.mxu1 %vm4875_vm2, %v4827_v16  ;;  %2269 = vmatprep.subr.msk.bf16.mxu0 %vm4877_vm6, %v4827_v16 }
 0x162   : > { %2461 = vmatprep.subr.msk.bf16.mxu1 %vm4879_vm7, %v4827_v16 }
 0x164   : > { %2271 = vmatpush1.bf16.msk.msra.mxu0 %vm3478_vm14, %v4827_v16 }
 0x165   : > { %2463 = vmatpush1.bf16.msk.msra.mxu1 %vm3491_vm15, %v4827_v16 }
 0x167   : > { %1040 = vmatmul.mubr.f32.vlgmr.msra.gmra.mrb[0].mxu0 %v4899_v23 }
 0x168   : > { %1752 = vmatmul.mubr.f32.vlgmr.msra.gmra.mrb[0].mxu1 %v4899_v23  ;;  %1045 = vmatprep.mubr.f32.mxu0 %v4611_v13 }
 0x169   : > { %1757 = vmatprep.mubr.f32.mxu1 %v4611_v13 }
 0x16b   : > { %1047 = vmatmul.mubr.f32.gmra.mrb[2].mxu0 %v4900_v49 }
 0x16c   : > { %1759 = vmatmul.mubr.f32.gmra.mrb[2].mxu1 %v4900_v49 }
 0x23a   : > { %v1041_v36 = vpop.f32.mrb[0].mxu0 }
 0x23b   : > { %v1753_v0 = vpop.f32.mrb[0].mxu1  ;;  %1765 = vst [vmem:[%s174_s17] sm:$0xff] %v1041_v36  ;;  %v1043_v60 = vpop.f32.mrb[1].mxu0 }
 0x23c   : > { %1767 = vst [vmem:[%s174_s17 + $0x10] sm:$0xff] %v1753_v0  ;;  %v1755_v2 = vpop.f32.mrb[1].mxu1  ;;  %1766 = vst [vmem:[%s174_s17 + $0x8] sm:$0xff] %v1043_v60 }
 0x23d   : > { %1768 = vst [vmem:[%s174_s17 + $0x18] sm:$0xff] %v1755_v2 }
 0x23e   : > { %v1048_v13 = vpop.f32.mrb[2].mxu0 }
 0x23f   : > { %v1760_v3 = vpop.f32.mrb[2].mxu1  ;;  %1769 = vst [vmem:[%s174_s17 + $0x20] sm:$0xff] %v1048_v13  ;;  %v1050_v41 = vpop.f32.mrb[3].mxu0 }
 0x240   : > { %1771 = vst [vmem:[%s174_s17 + $0x30] sm:$0xff] %v1760_v3  ;;  %v1762_v50 = vpop.f32.mrb[3].mxu1  ;;  %1770 = vst [vmem:[%s174_s17 + $0x28] sm:$0xff] %v1050_v41 }
 0x241   : > { %1772 = vst [vmem:[%s174_s17 + $0x38] sm:$0xff] %v1762_v50 }
 0x242   : > { %2639 = shalt.err (!%p2636_p7)
}
 0x243   : > { %s2640_s7 = scalar_lea.hbm %s4268_s30, 1024  ;;  %s2644_s25 = scalar_lea.hbm %s4314_s2, 2048 }
 0x244   : > { %p2641_p9 = scmp.ne.s32.totalorder %s4268_s30, %s2640_s7  ;;  %p2645_p0 = scmp.lt.u32.totalorder %s4268_s30, %s4314_s2 }
 0x245   : > { %p2646_p1 = scmp.lt.u32.totalorder %s2644_s25, %s2640_s7  ;;  %p2648_p4 = scmp.lt.u32.totalorder %s2640_s7, %s4268_s30 }
 0x246   : > { %p2642_p2 = pnand %p2641_p9, %p2814_p12 }
 0x247   : > { %p2647_p11 = por %p2646_p1, %p2645_p0 }
 0x248   : > { %p2643_p5 = pneg %p2642_p2 }
 0x249   : > { %p2649_p6 = por %p2648_p4, %p2647_p11 }
 0x24b   : > { %p2650_p8 = pnand %p2649_p6, %p2643_p5 }
 0x24d   : > { %2653 = shalt.err (!%p2650_p8)
}
 0x24e   : > { %s2705_s29 = smov 512   ;;  %s2706_s15 = smov 1024  }
 0x24f   : > { %s2707_s17 = smov 32  }
 0x250   : > { %2510 = dma.vmem_to_hbm [thread:$0]  (%p2814_p12), %s4263_s27, 1024, %s4268_s30, %s1774_s13, %s2705_s29, %s2706_s15, %s2707_s17  }
 0x251 PF: > { %s1802_s22 = sand.u32 1, %s2684_s9   ;;  %p4921_p10 = scmp.ne.s32.totalorder %s4540_s16, 0 }
 0x252   : > { %p4922_p13 = scmp.ge.s32.totalorder %s2696_s12, 2  ;;  %s1803_s23 = scalar_lea.sflag [#allocation4], %s1802_s22 }
 0x254   : > { %p2521_p3 = pnand %p4922_p13, %p4921_p10 }
 0x256   : > { %2679 = dma.done.wait (!%p2521_p3), %s1803_s23, 1024  }
 0x257   : > { %2681 = vsyncadd (!%p2521_p3), %s1803_s23, 4294966272  ;;  %p16_p7 = scmp.ge.s32.totalorder %s2779_s21, 4   ;;  %s4923_s9 = smov %s2688_s10 }
 0x258   : > { %s4924_s10 = smov %s2692_s11  ;;  %s4925_s11 = smov %s2810_s8 }
 0x259   : > { %s4926_s12 = smov %s2779_s21  ;;  %18 = sbr.rel (!%p16_p7) target bundleno = 6 (0x6), region = 77 }
 0x260   :  { %1808 = vsyncpa [#allocation3], 1 }
 0x261   :  { %1810 = vsyncpa [#allocation3 + $0x1], 1 }
 0x262   :  { %1811 = vsyncpa [#allocation6], 1 }
 0x263   :  { %1812 = vsyncpa [#allocation4], 1 }
 0x264   :  { %1814 = vsyncpa [#allocation4 + $0x1], 1 }

</bundles_post_ra>
